<compile_context>
chip_gen: v7x
topology: tpu7x:2x2x1
jax: 0.10.0
libtpu: 0.0.40
codegen_flags: <defaults>
</compile_context>

<pallas_src>
import math
from functools import partial

import jax
import jax.numpy as jnp
from jax.experimental import pallas as pl
from jax.experimental.pallas import tpu as pltpu


# ----------------------------------------------------------------------------
# small helpers
# ----------------------------------------------------------------------------

_PARALLEL_1D = pltpu.CompilerParams(dimension_semantics=("parallel",))


def _row_tile(n, max_tile=512):
    """Largest row tile (<= max_tile) dividing n; full array at toy sizes."""
    if n <= max_tile:
        return n
    for t in range(max_tile - max_tile % 8, 7, -8):
        if n % t == 0:
            return t
    return n


# ----------------------------------------------------------------------------
# Pallas kernels
# ----------------------------------------------------------------------------

def _linear_kernel(x_ref, w_ref, b_ref, o_ref):
    acc = jnp.dot(x_ref[...], w_ref[...], preferred_element_type=jnp.float32)
    o_ref[...] = (acc + b_ref[...]).astype(o_ref.dtype)


def pallas_linear(x, w, b):
    """y = x @ w + b, row-tiled over N with weights resident."""
    n, din = x.shape
    dout = w.shape[1]
    tile = _row_tile(n)
    return pl.pallas_call(
        _linear_kernel,
        out_shape=jax.ShapeDtypeStruct((n, dout), x.dtype),
        grid=(n // tile,),
        in_specs=[
            pl.BlockSpec((tile, din), lambda i: (i, 0)),
            pl.BlockSpec((din, dout), lambda i: (0, 0)),
            pl.BlockSpec((1, dout), lambda i: (0, 0)),
        ],
        out_specs=pl.BlockSpec((tile, dout), lambda i: (i, 0)),
        compiler_params=_PARALLEL_1D,
    )(x, w, b.reshape(1, dout))


def _qkv_kernel(scale, xq_ref, xkv_ref, pq_ref, pkv_ref, w_ref, b_ref,
                q_ref, k_ref, v_ref):
    """q = ((xq+pos_q) Wq + bq) * scale ; k = (xkv+pos_kv) Wk + bk ; v = xkv Wv + bv."""
    d = xq_ref.shape[-1]
    xq = xq_ref[...].astype(jnp.float32)
    xkv = xkv_ref[...].astype(jnp.float32)
    qp = xq + pq_ref[...].astype(jnp.float32)
    kp = xkv + pkv_ref[...].astype(jnp.float32)
    w = w_ref[...].astype(jnp.float32)          # (D, 3D) packed [Wq | Wk | Wv]
    b = b_ref[...].astype(jnp.float32)          # (1, 3D)
    q = jnp.dot(qp, w[:, :d], preferred_element_type=jnp.float32) + b[:, :d]
    k = jnp.dot(kp, w[:, d:2 * d], preferred_element_type=jnp.float32) + b[:, d:2 * d]
    v = jnp.dot(xkv, w[:, 2 * d:], preferred_element_type=jnp.float32) + b[:, 2 * d:]
    q_ref[...] = (q * scale).astype(q_ref.dtype)
    k_ref[...] = k.astype(k_ref.dtype)
    v_ref[...] = v.astype(v_ref.dtype)


def pallas_qkv(xq, xkv, pos_q, pos_kv, w_qkv, b_qkv, scale):
    n, d = xq.shape
    d3 = w_qkv.shape[1]
    tile = _row_tile(n)
    row_spec = pl.BlockSpec((tile, d), lambda i: (i, 0))
    return pl.pallas_call(
        partial(_qkv_kernel, scale),
        out_shape=(jax.ShapeDtypeStruct((n, d), xq.dtype),) * 3,
        grid=(n // tile,),
        in_specs=[row_spec, row_spec, row_spec, row_spec,
                  pl.BlockSpec((d, d3), lambda i: (0, 0)),
                  pl.BlockSpec((1, d3), lambda i: (0, 0))],
        out_specs=[row_spec, row_spec, row_spec],
        compiler_params=_PARALLEL_1D,
    )(xq, xkv, pos_q, pos_kv, w_qkv, b_qkv.reshape(1, d3))


def _attn_kernel(nhead, q_ref, k_ref, v_ref, bias_ref, o_ref):
    """softmax(q k^T + bias) @ v for all heads of one batch element.

    q/k/v blocks: (1, S, D) with heads packed along D (q pre-scaled by 1/sqrt(dh)).
    bias block:   (1, 1, Sk) additive key-padding bias (0 or -1e9), shared by heads.
    """
    d = q_ref.shape[-1]
    dh = d // nhead
    q = q_ref[0].astype(jnp.float32)            # (Sq, D)
    k = k_ref[0].astype(jnp.float32)            # (Sk, D)
    v = v_ref[0].astype(jnp.float32)            # (Sk, D)
    bias = bias_ref[0].astype(jnp.float32)      # (1, Sk)
    for h in range(nhead):                      # static unrolled head loop
        sl = slice(h * dh, (h + 1) * dh)
        s = jax.lax.dot_general(q[:, sl], k[:, sl], (((1,), (1,)), ((), ())),
                                preferred_element_type=jnp.float32)
        s = s + bias
        m = jnp.max(s, axis=-1, keepdims=True)
        p = jnp.exp(s - m)
        denom = jnp.sum(p, axis=-1, keepdims=True)
        o = jnp.dot(p * pl.reciprocal(denom, approx=True), v[:, sl],
                    preferred_element_type=jnp.float32)
        o_ref[0, :, sl] = o.astype(o_ref.dtype)


def pallas_attention(q_bsd, k_bsd, v_bsd, bias, nhead):
    B, Sq, D = q_bsd.shape
    Sk = k_bsd.shape[1]
    return pl.pallas_call(
        partial(_attn_kernel, nhead),
        out_shape=jax.ShapeDtypeStruct((B, Sq, D), q_bsd.dtype),
        grid=(B,),
        in_specs=[
            pl.BlockSpec((1, Sq, D), lambda b: (b, 0, 0)),
            pl.BlockSpec((1, Sk, D), lambda b: (b, 0, 0)),
            pl.BlockSpec((1, Sk, D), lambda b: (b, 0, 0)),
            pl.BlockSpec((1, 1, Sk), lambda b: (b, 0, 0)),
        ],
        out_specs=pl.BlockSpec((1, Sq, D), lambda b: (b, 0, 0)),
        compiler_params=_PARALLEL_1D,
    )(q_bsd, k_bsd, v_bsd, bias)


def _proj_add_ln_kernel(attn_ref, res_ref, w_ref, b_ref, g_ref, beta_ref, o_ref):
    """LayerNorm(residual + attn @ Wo + bo), one-pass statistics."""
    a = attn_ref[...].astype(jnp.float32)
    r = res_ref[...].astype(jnp.float32)
    x = r + jnp.dot(a, w_ref[...], preferred_element_type=jnp.float32) + b_ref[...]
    mu = jnp.mean(x, axis=-1, keepdims=True)
    var = jnp.mean(x * x, axis=-1, keepdims=True) - mu * mu
    xn = (x - mu) * jax.lax.rsqrt(var + 1e-5)
    o_ref[...] = (xn * g_ref[...] + beta_ref[...]).astype(o_ref.dtype)


def pallas_proj_add_ln(attn, residual, wo, bo, gamma, beta):
    n, d = residual.shape
    tile = _row_tile(n)
    row_spec = pl.BlockSpec((tile, d), lambda i: (i, 0))
    vec_spec = pl.BlockSpec((1, d), lambda i: (0, 0))
    return pl.pallas_call(
        _proj_add_ln_kernel,
        out_shape=jax.ShapeDtypeStruct((n, d), residual.dtype),
        grid=(n // tile,),
        in_specs=[row_spec, row_spec,
                  pl.BlockSpec((d, d), lambda i: (0, 0)),
                  vec_spec, vec_spec, vec_spec],
        out_specs=row_spec,
        compiler_params=_PARALLEL_1D,
    )(attn, residual, wo, bo.reshape(1, d), gamma.reshape(1, d), beta.reshape(1, d))


def _ffn_add_ln_kernel(x_ref, w1_ref, b1_ref, w2_ref, b2_ref, g_ref, beta_ref, o_ref):
    """LayerNorm(x + relu(x @ W1 + b1) @ W2 + b2), one-pass statistics."""
    x = x_ref[...].astype(jnp.float32)
    h = jnp.dot(x, w1_ref[...], preferred_element_type=jnp.float32) + b1_ref[...]
    h = jnp.maximum(h, 0.0)
    y = x + jnp.dot(h, w2_ref[...], preferred_element_type=jnp.float32) + b2_ref[...]
    mu = jnp.mean(y, axis=-1, keepdims=True)
    var = jnp.mean(y * y, axis=-1, keepdims=True) - mu * mu
    yn = (y - mu) * jax.lax.rsqrt(var + 1e-5)
    o_ref[...] = (yn * g_ref[...] + beta_ref[...]).astype(o_ref.dtype)


def pallas_ffn_add_ln(x, w1, b1, w2, b2, gamma, beta):
    n, d = x.shape
    f = w1.shape[1]
    tile = _row_tile(n)
    row_spec = pl.BlockSpec((tile, d), lambda i: (i, 0))
    return pl.pallas_call(
        _ffn_add_ln_kernel,
        out_shape=jax.ShapeDtypeStruct((n, d), x.dtype),
        grid=(n // tile,),
        in_specs=[row_spec,
                  pl.BlockSpec((d, f), lambda i: (0, 0)),
                  pl.BlockSpec((1, f), lambda i: (0, 0)),
                  pl.BlockSpec((f, d), lambda i: (0, 0)),
                  pl.BlockSpec((1, d), lambda i: (0, 0)),
                  pl.BlockSpec((1, d), lambda i: (0, 0)),
                  pl.BlockSpec((1, d), lambda i: (0, 0))],
        out_specs=row_spec,
        compiler_params=_PARALLEL_1D,
    )(x, w1, b1.reshape(1, f), w2, b2.reshape(1, d),
      gamma.reshape(1, d), beta.reshape(1, d))


# ----------------------------------------------------------------------------
# Model (glue in plain JAX, compute in Pallas)
# ----------------------------------------------------------------------------

def position_encoding_sine(mask, d_model, temperature=10000.0):
    """1D sine positional encoding (DETR-style). mask: (B, S) bool, True = padding.
    Returns pos: (S, B, d_model)."""
    B, S = mask.shape
    not_mask = (~mask).astype(jnp.float32)
    embed = jnp.cumsum(not_mask, axis=1)
    eps = 1e-6
    embed = embed / (embed[:, -1:] + eps) * 2.0 * math.pi
    dim_t = jnp.arange(d_model, dtype=jnp.float32)
    dim_t = temperature ** (2.0 * jnp.floor(dim_t / 2.0) / d_model)
    pos = embed[:, :, None] / dim_t[None, None, :]        # (B, S, D)
    pos = jnp.stack([jnp.sin(pos[:, :, 0::2]),
                     jnp.cos(pos[:, :, 1::2])], axis=3).reshape(B, S, d_model)
    return pos.transpose(1, 0, 2)                         # (S, B, D)


def _mha_block(p_attn, ln_p, xq, xkv, pos_q, pos_kv, bias, nhead, S, B):
    """Fused MHA block: QKV proj (pos adds + q-scale inside) -> all-head attention
    -> fused out-proj + residual-add + LayerNorm. All inputs flattened (S*B, D)."""
    D = xq.shape[-1]
    scale = 1.0 / math.sqrt(D // nhead)
    q, k, v = pallas_qkv(xq, xkv, pos_q, pos_kv,
                         p_attn['w_qkv'], p_attn['b_qkv'], scale)

    def to_bsd(x):          # (S*B, D) -> (B, S, D)
        return x.reshape(S, B, D).transpose(1, 0, 2)

    attn = pallas_attention(to_bsd(q), to_bsd(k), to_bsd(v), bias, nhead)  # (B, S, D)
    attn_flat = attn.transpose(1, 0, 2).reshape(S * B, D)
    return pallas_proj_add_ln(attn_flat, xq, p_attn['wo'], p_attn['bo'],
                              ln_p[0], ln_p[1])


def _encoder_layer(p, src, pos, bias_src, nhead, S, B):
    src = _mha_block(p['self_attn'], p['norm1'], src, src, pos, pos,
                     bias_src, nhead, S, B)
    src = pallas_ffn_add_ln(src, p['lin1'][0], p['lin1'][1],
                            p['lin2'][0], p['lin2'][1],
                            p['norm2'][0], p['norm2'][1])
    return src


def _decoder_layer(p, tgt, memory, query_pos, pos, bias_pad, bias_src, nhead, S, B):
    tgt = _mha_block(p['self_attn'], p['norm1'], tgt, tgt, query_pos, query_pos,
                     bias_pad, nhead, S, B)
    tgt = _mha_block(p['cross_attn'], p['norm2'], tgt, memory, query_pos, pos,
                     bias_src, nhead, S, B)
    tgt = pallas_ffn_add_ln(tgt, p['lin1'][0], p['lin1'][1],
                            p['lin2'][0], p['lin2'][1],
                            p['norm3'][0], p['norm3'][1])
    return tgt


def transformer_forward(params, input_src, mask_src, pos_src,
                        input_tar, mask_pad, pos_tar, sample_rate, *, nhead):
    # input_src / input_tar: (B, C, S)
    del sample_rate  # TODO(synk): sample-rate frame masking not reproduced.
    B, C, S = input_src.shape
    D = params['in_proj'][0].shape[1]

    src_flat = input_src.transpose(2, 0, 1).reshape(S * B, C)   # (S*B, C)
    tar_flat = input_tar.transpose(2, 0, 1).reshape(S * B, C)

    # single input-projection launch for src + tar
    proj = pallas_linear(jnp.concatenate([src_flat, tar_flat], axis=0),
                         *params['in_proj'])                    # (2*S*B, D)
    memory, hs = proj[:S * B], proj[S * B:]

    pos_src_flat = pos_src.reshape(S * B, D)
    pos_tar_flat = pos_tar.reshape(S * B, D)

    # additive key-padding biases built ONCE at (B, 1, Sk) -- no per-head repeat
    bias_src = jnp.where(mask_src, -1e9, 0.0).astype(jnp.float32)[:, None, :]
    bias_pad = jnp.where(mask_pad, -1e9, 0.0).astype(jnp.float32)[:, None, :]

    for lp in params['enc_layers']:
        memory = _encoder_layer(lp, memory, pos_src_flat, bias_src, nhead, S, B)

    for lp in params['dec_layers']:
        hs = _decoder_layer(lp, hs, memory, pos_tar_flat, pos_src_flat,
                            bias_pad, bias_src, nhead, S, B)

    # single output-head launch for pred + reco.
    # TODO(synk): C=4 output last dim is a lane-masked store; pad C if this head
    #             ever becomes hot at scale.
    out = pallas_linear(jnp.concatenate([hs, memory], axis=0), *params['out_proj'])
    pred = out[:S * B].reshape(S, B, C)
    reco = out[S * B:].reshape(S, B, C)
    return pred, reco   # both (S, B, C) -- sequence-first, like the PyTorch module


def mot_interp_forward(params, input_src, input_tar, mask_src, mask_pad,
                       *, d_model, nhead, train_sample_rate):
    pos_src = position_encoding_sine(mask_src, d_model)   # (S, B, D)
    pos_tar = pos_src
    pred, reco = transformer_forward(params, input_src, mask_src, pos_src,
                                     input_tar, mask_pad, pos_tar,
                                     train_sample_rate, nhead=nhead)
    pred = pred.transpose(1, 2, 0)   # (B, C, S)  == pred.permute(1, 2, 0)
    reco = reco.transpose(1, 2, 0)
    return pred, reco


# ----------------------------------------------------------------------------
# Deterministic parameter init (QKV weights packed as (D, 3D))
# ----------------------------------------------------------------------------

def init_params(key, c_in, d_model, nhead, d_ffn, n_enc, n_dec):
    keys = iter(jax.random.split(key, 256))

    def lin(din, dout):
        w = jax.random.normal(next(keys), (din, dout), jnp.float32) / math.sqrt(din)
        b = jnp.zeros((dout,), jnp.float32)
        return (w, b)

    def norm(d):
        return (jnp.ones((d,), jnp.float32), jnp.zeros((d,), jnp.float32))

    def attn(d):
        wq, _ = lin(d, d)
        wk, _ = lin(d, d)
        wv, _ = lin(d, d)
        wo, bo = lin(d, d)
        return dict(
            w_qkv=jnp.concatenate([wq, wk, wv], axis=1),   # (D, 3D)
            b_qkv=jnp.zeros((3 * d,), jnp.float32),
            wo=wo, bo=bo,
        )

    def enc_layer():
        return dict(self_attn=attn(d_model), norm1=norm(d_model),
                    lin1=lin(d_model, d_ffn), lin2=lin(d_ffn, d_model),
                    norm2=norm(d_model))

    def dec_layer():
        return dict(self_attn=attn(d_model), cross_attn=attn(d_model),
                    norm1=norm(d_model), norm2=norm(d_model), norm3=norm(d_model),
                    lin1=lin(d_model, d_ffn), lin2=lin(d_ffn, d_model))

    return dict(
        in_proj=lin(c_in, d_model),
        out_proj=lin(d_model, c_in),
        enc_layers=[enc_layer() for _ in range(n_enc)],
        dec_layers=[dec_layer() for _ in range(n_dec)],
    )


# ----------------------------------------------------------------------------
# Main
# ----------------------------------------------------------------------------

if __name__ == "__main__":
    B, C, S = 2, 4, 8           # batch, pose channels, sequence length (time)
    D_MODEL, NHEAD, D_FFN = 32, 4, 64
    N_ENC, N_DEC = 2, 2
    TRAIN_SAMPLE_RATE = 0.2

    key = jax.random.PRNGKey(0)
    k_par, k_src, k_tar = jax.random.split(key, 3)

    params = init_params(k_par, C, D_MODEL, NHEAD, D_FFN, N_ENC, N_DEC)

    input_src = jax.random.normal(k_src, (B, C, S), jnp.float32)   # data['input']
    input_tar = jax.random.normal(k_tar, (B, C, S), jnp.float32)   # data['interp']
    # key-padding masks: True == padded frame
    mask_src = jnp.array([[False] * S,
                          [False] * (S - 2) + [True] * 2], dtype=bool)   # data['src_mask']
    mask_pad = jnp.array([[False] * S,
                          [False] * (S - 1) + [True] * 1], dtype=bool)   # data['mask']

    fwd = jax.jit(partial(mot_interp_forward,
                          d_model=D_MODEL, nhead=NHEAD,
                          train_sample_rate=TRAIN_SAMPLE_RATE))

    pred, reco = fwd(params, input_src, input_tar, mask_src, mask_pad)
    jax.block_until_ready((pred, reco))

    assert pred.shape == (B, C, S) and reco.shape == (B, C, S)
    assert bool(jnp.all(jnp.isfinite(pred))) and bool(jnp.all(jnp.isfinite(reco)))
    print("KERNEL_OK")
</pallas_src>

<mosaic_0001>
module attributes {stable_mosaic.version = 11 : i64} {
  func.func @_linear_kernel(%arg0: i32, %arg1: memref<32x4xf32, #tpu.memory_space<vmem>>, %arg2: memref<4x32xf32, #tpu.memory_space<vmem>>, %arg3: memref<1x32xf32, #tpu.memory_space<vmem>>, %arg4: memref<32x32xf32, #tpu.memory_space<vmem>>) attributes {dimension_semantics = [#tpu.dimension_semantics<parallel>], iteration_bounds = array<i64: 1>, scalar_prefetch = 0 : i64, scratch_operands = 0 : i64, tpu.core_type = #tpu.core_type<tc>, window_params = [{transform_indices = @transform_0, window_bounds = array<i64: 32, 4>}, {pipeline_mode = #tpu.pipeline_mode<synchronous>, transform_indices = @transform_1, window_bounds = array<i64: 4, 32>}, {pipeline_mode = #tpu.pipeline_mode<synchronous>, transform_indices = @transform_2, window_bounds = array<i64: 1, 32>}, {transform_indices = @transform_3, window_bounds = array<i64: 32, 32>}]} {
    %c0 = arith.constant 0 : index
    %c0_0 = arith.constant 0 : index
    %0 = vector.load %arg1[%c0, %c0_0] : memref<32x4xf32, #tpu.memory_space<vmem>>, vector<32x4xf32>
    %c0_1 = arith.constant 0 : index
    %c0_2 = arith.constant 0 : index
    %1 = vector.load %arg2[%c0_1, %c0_2] : memref<4x32xf32, #tpu.memory_space<vmem>>, vector<4x32xf32>
    %cst = arith.constant dense<0.000000e+00> : vector<32x32xf32>
    %2 = tpu.matmul %0, %1, %cst {dimension_numbers = #tpu.dot_dimension_numbers<[1], [0], [0], [1], [0, 0, 1, 1], [], []>} : vector<32x4xf32>, vector<4x32xf32>, vector<32x32xf32> -> vector<32x32xf32>
    %c0_3 = arith.constant 0 : index
    %c0_4 = arith.constant 0 : index
    %3 = vector.load %arg3[%c0_3, %c0_4] : memref<1x32xf32, #tpu.memory_space<vmem>>, vector<1x32xf32>
    %4 = vector.broadcast %3 : vector<1x32xf32> to vector<32x32xf32>
    %5 = arith.addf %2, %4 : vector<32x32xf32>
    %c0_5 = arith.constant 0 : index
    %c0_6 = arith.constant 0 : index
    %6 = vector.load %arg4[%c0_5, %c0_6] : memref<32x32xf32, #tpu.memory_space<vmem>>, vector<32x32xf32>
    tpu.vector_store %arg4[%c0_5, %c0_6], %5 {strides = array<i32>} : memref<32x32xf32, #tpu.memory_space<vmem>>, vector<32x32xf32>,
    return
  }
  func.func @transform_0(%arg0: i32) -> (i32, i32) {
    %c0_i32 = arith.constant 0 : i32
    %c0_i32_0 = arith.constant 0 : i32
    return %arg0, %c0_i32 : i32, i32
  }
  func.func @transform_1(%arg0: i32) -> (i32, i32) {
    %c0_i32 = arith.constant 0 : i32
    %c0_i32_0 = arith.constant 0 : i32
    %c0_i32_1 = arith.constant 0 : i32
    return %c0_i32, %c0_i32_0 : i32, i32
  }
  func.func @transform_2(%arg0: i32) -> (i32, i32) {
    %c0_i32 = arith.constant 0 : i32
    %c0_i32_0 = arith.constant 0 : i32
    %c0_i32_1 = arith.constant 0 : i32
    return %c0_i32, %c0_i32_0 : i32, i32
  }
  func.func @transform_3(%arg0: i32) -> (i32, i32) {
    %c0_i32 = arith.constant 0 : i32
    %c0_i32_0 = arith.constant 0 : i32
    return %arg0, %c0_i32 : i32, i32
  }
}

module attributes {stable_mosaic.version = 11 : i64} {
  func.func @_qkv_kernel(%arg0: i32, %arg1: memref<16x32xf32, #tpu.memory_space<vmem>>, %arg2: memref<16x32xf32, #tpu.memory_space<vmem>>, %arg3: memref<16x32xf32, #tpu.memory_space<vmem>>, %arg4: memref<16x32xf32, #tpu.memory_space<vmem>>, %arg5: memref<32x96xf32, #tpu.memory_space<vmem>>, %arg6: memref<1x96xf32, #tpu.memory_space<vmem>>, %arg7: memref<16x32xf32, #tpu.memory_space<vmem>>, %arg8: memref<16x32xf32, #tpu.memory_space<vmem>>, %arg9: memref<16x32xf32, #tpu.memory_space<vmem>>) attributes {dimension_semantics = [#tpu.dimension_semantics<parallel>], iteration_bounds = array<i64: 1>, scalar_prefetch = 0 : i64, scratch_operands = 0 : i64, tpu.core_type = #tpu.core_type<tc>, window_params = [{transform_indices = @transform_0, window_bounds = array<i64: 16, 32>}, {transform_indices = @transform_1, window_bounds = array<i64: 16, 32>}, {transform_indices = @transform_2, window_bounds = array<i64: 16, 32>}, {transform_indices = @transform_3, window_bounds = array<i64: 16, 32>}, {pipeline_mode = #tpu.pipeline_mode<synchronous>, transform_indices = @transform_4, window_bounds = array<i64: 32, 96>}, {pipeline_mode = #tpu.pipeline_mode<synchronous>, transform_indices = @transform_5, window_bounds = array<i64: 1, 96>}, {transform_indices = @transform_6, window_bounds = array<i64: 16, 32>}, {transform_indices = @transform_7, window_bounds = array<i64: 16, 32>}, {transform_indices = @transform_8, window_bounds = array<i64: 16, 32>}]} {
    %c0 = arith.constant 0 : index
    %c0_0 = arith.constant 0 : index
    %0 = vector.load %arg1[%c0, %c0_0] : memref<16x32xf32, #tpu.memory_space<vmem>>, vector<16x32xf32>
    %c0_1 = arith.constant 0 : index
    %c0_2 = arith.constant 0 : index
    %1 = vector.load %arg2[%c0_1, %c0_2] : memref<16x32xf32, #tpu.memory_space<vmem>>, vector<16x32xf32>
    %c0_3 = arith.constant 0 : index
    %c0_4 = arith.constant 0 : index
    %2 = vector.load %arg3[%c0_3, %c0_4] : memref<16x32xf32, #tpu.memory_space<vmem>>, vector<16x32xf32>
    %3 = arith.addf %0, %2 : vector<16x32xf32>
    %c0_5 = arith.constant 0 : index
    %c0_6 = arith.constant 0 : index
    %4 = vector.load %arg4[%c0_5, %c0_6] : memref<16x32xf32, #tpu.memory_space<vmem>>, vector<16x32xf32>
    %5 = arith.addf %1, %4 : vector<16x32xf32>
    %c0_7 = arith.constant 0 : index
    %c0_8 = arith.constant 0 : index
    %6 = vector.load %arg5[%c0_7, %c0_8] : memref<32x96xf32, #tpu.memory_space<vmem>>, vector<32x96xf32>
    %c0_9 = arith.constant 0 : index
    %c0_10 = arith.constant 0 : index
    %7 = vector.load %arg6[%c0_9, %c0_10] : memref<1x96xf32, #tpu.memory_space<vmem>>, vector<1x96xf32>
    %8 = vector.extract_strided_slice %6 {offsets = [0, 0], sizes = [32, 32], strides = [1, 1]} : vector<32x96xf32> to vector<32x32xf32>
    %cst = arith.constant dense<0.000000e+00> : vector<16x32xf32>
    %9 = tpu.matmul %3, %8, %cst {dimension_numbers = #tpu.dot_dimension_numbers<[1], [0], [0], [1], [0, 0, 1, 1], [], []>} : vector<16x32xf32>, vector<32x32xf32>, vector<16x32xf32> -> vector<16x32xf32>
    %10 = vector.extract_strided_slice %7 {offsets = [0, 0], sizes = [1, 32], strides = [1, 1]} : vector<1x96xf32> to vector<1x32xf32>
    %11 = vector.broadcast %10 : vector<1x32xf32> to vector<16x32xf32>
    %12 = arith.addf %9, %11 : vector<16x32xf32>
    %13 = vector.extract_strided_slice %6 {offsets = [0, 32], sizes = [32, 32], strides = [1, 1]} : vector<32x96xf32> to vector<32x32xf32>
    %cst_11 = arith.constant dense<0.000000e+00> : vector<16x32xf32>
    %14 = tpu.matmul %5, %13, %cst_11 {dimension_numbers = #tpu.dot_dimension_numbers<[1], [0], [0], [1], [0, 0, 1, 1], [], []>} : vector<16x32xf32>, vector<32x32xf32>, vector<16x32xf32> -> vector<16x32xf32>
    %15 = vector.extract_strided_slice %7 {offsets = [0, 32], sizes = [1, 32], strides = [1, 1]} : vector<1x96xf32> to vector<1x32xf32>
    %16 = vector.broadcast %15 : vector<1x32xf32> to vector<16x32xf32>
    %17 = arith.addf %14, %16 : vector<16x32xf32>
    %18 = vector.extract_strided_slice %6 {offsets = [0, 64], sizes = [32, 32], strides = [1, 1]} : vector<32x96xf32> to vector<32x32xf32>
    %cst_12 = arith.constant dense<0.000000e+00> : vector<16x32xf32>
    %19 = tpu.matmul %1, %18, %cst_12 {dimension_numbers = #tpu.dot_dimension_numbers<[1], [0], [0], [1], [0, 0, 1, 1], [], []>} : vector<16x32xf32>, vector<32x32xf32>, vector<16x32xf32> -> vector<16x32xf32>
    %20 = vector.extract_strided_slice %7 {offsets = [0, 64], sizes = [1, 32], strides = [1, 1]} : vector<1x96xf32> to vector<1x32xf32>
    %21 = vector.broadcast %20 : vector<1x32xf32> to vector<16x32xf32>
    %22 = arith.addf %19, %21 : vector<16x32xf32>
    %cst_13 = arith.constant 0.353553385 : f32
    %23 = vector.broadcast %cst_13 : f32 to vector<16x32xf32>
    %24 = arith.mulf %12, %23 : vector<16x32xf32>
    %c0_14 = arith.constant 0 : index
    %c0_15 = arith.constant 0 : index
    %25 = vector.load %arg7[%c0_14, %c0_15] : memref<16x32xf32, #tpu.memory_space<vmem>>, vector<16x32xf32>
    tpu.vector_store %arg7[%c0_14, %c0_15], %24 {strides = array<i32>} : memref<16x32xf32, #tpu.memory_space<vmem>>, vector<16x32xf32>,
    %c0_16 = arith.constant 0 : index
    %c0_17 = arith.constant 0 : index
    %26 = vector.load %arg8[%c0_16, %c0_17] : memref<16x32xf32, #tpu.memory_space<vmem>>, vector<16x32xf32>
    tpu.vector_store %arg8[%c0_16, %c0_17], %17 {strides = array<i32>} : memref<16x32xf32, #tpu.memory_space<vmem>>, vector<16x32xf32>,
    %c0_18 = arith.constant 0 : index
    %c0_19 = arith.constant 0 : index
    %27 = vector.load %arg9[%c0_18, %c0_19] : memref<16x32xf32, #tpu.memory_space<vmem>>, vector<16x32xf32>
    tpu.vector_store %arg9[%c0_18, %c0_19], %22 {strides = array<i32>} : memref<16x32xf32, #tpu.memory_space<vmem>>, vector<16x32xf32>,
    return
  }
  func.func @transform_0(%arg0: i32) -> (i32, i32) {
    %c0_i32 = arith.constant 0 : i32
    %c0_i32_0 = arith.constant 0 : i32
    return %arg0, %c0_i32 : i32, i32
  }
  func.func @transform_1(%arg0: i32) -> (i32, i32) {
    %c0_i32 = arith.constant 0 : i32
    %c0_i32_0 = arith.constant 0 : i32
    return %arg0, %c0_i32 : i32, i32
  }
  func.func @transform_2(%arg0: i32) -> (i32, i32) {
    %c0_i32 = arith.constant 0 : i32
    %c0_i32_0 = arith.constant 0 : i32
    return %arg0, %c0_i32 : i32, i32
  }
  func.func @transform_3(%arg0: i32) -> (i32, i32) {
    %c0_i32 = arith.constant 0 : i32
    %c0_i32_0 = arith.constant 0 : i32
    return %arg0, %c0_i32 : i32, i32
  }
  func.func @transform_4(%arg0: i32) -> (i32, i32) {
    %c0_i32 = arith.constant 0 : i32
    %c0_i32_0 = arith.constant 0 : i32
    %c0_i32_1 = arith.constant 0 : i32
    return %c0_i32, %c0_i32_0 : i32, i32
  }
  func.func @transform_5(%arg0: i32) -> (i32, i32) {
    %c0_i32 = arith.constant 0 : i32
    %c0_i32_0 = arith.constant 0 : i32
    %c0_i32_1 = arith.constant 0 : i32
    return %c0_i32, %c0_i32_0 : i32, i32
  }
  func.func @transform_6(%arg0: i32) -> (i32, i32) {
    %c0_i32 = arith.constant 0 : i32
    %c0_i32_0 = arith.constant 0 : i32
    return %arg0, %c0_i32 : i32, i32
  }
  func.func @transform_7(%arg0: i32) -> (i32, i32) {
    %c0_i32 = arith.constant 0 : i32
    %c0_i32_0 = arith.constant 0 : i32
    return %arg0, %c0_i32 : i32, i32
  }
  func.func @transform_8(%arg0: i32) -> (i32, i32) {
    %c0_i32 = arith.constant 0 : i32
    %c0_i32_0 = arith.constant 0 : i32
    return %arg0, %c0_i32 : i32, i32
  }
}

module attributes {stable_mosaic.version = 11 : i64} {
  func.func @_attn_kernel(%arg0: i32, %arg1: memref<1x8x32xf32, #tpu.memory_space<vmem>>, %arg2: memref<1x8x32xf32, #tpu.memory_space<vmem>>, %arg3: memref<1x8x32xf32, #tpu.memory_space<vmem>>, %arg4: memref<1x1x8xf32, #tpu.memory_space<vmem>>, %arg5: memref<1x8x32xf32, #tpu.memory_space<vmem>>) attributes {dimension_semantics = [#tpu.dimension_semantics<parallel>], iteration_bounds = array<i64: 2>, scalar_prefetch = 0 : i64, scratch_operands = 0 : i64, tpu.core_type = #tpu.core_type<tc>, window_params = [{transform_indices = @transform_0, window_bounds = array<i64: 1, 8, 32>}, {transform_indices = @transform_1, window_bounds = array<i64: 1, 8, 32>}, {transform_indices = @transform_2, window_bounds = array<i64: 1, 8, 32>}, {transform_indices = @transform_3, window_bounds = array<i64: 1, 1, 8>}, {transform_indices = @transform_4, window_bounds = array<i64: 1, 8, 32>}]} {
    %c0 = arith.constant 0 : index
    %c0_0 = arith.constant 0 : index
    %c0_1 = arith.constant 0 : index
    %0 = vector.load %arg1[%c0, %c0_0, %c0_1] : memref<1x8x32xf32, #tpu.memory_space<vmem>>, vector<1x8x32xf32>
    %1 = vector.shape_cast %0 : vector<1x8x32xf32> to vector<8x32xf32>
    %c0_2 = arith.constant 0 : index
    %c0_3 = arith.constant 0 : index
    %c0_4 = arith.constant 0 : index
    %2 = vector.load %arg2[%c0_2, %c0_3, %c0_4] : memref<1x8x32xf32, #tpu.memory_space<vmem>>, vector<1x8x32xf32>
    %3 = vector.shape_cast %2 : vector<1x8x32xf32> to vector<8x32xf32>
    %c0_5 = arith.constant 0 : index
    %c0_6 = arith.constant 0 : index
    %c0_7 = arith.constant 0 : index
    %4 = vector.load %arg3[%c0_5, %c0_6, %c0_7] : memref<1x8x32xf32, #tpu.memory_space<vmem>>, vector<1x8x32xf32>
    %5 = vector.shape_cast %4 : vector<1x8x32xf32> to vector<8x32xf32>
    %c0_8 = arith.constant 0 : index
    %c0_9 = arith.constant 0 : index
    %c0_10 = arith.constant 0 : index
    %6 = vector.load %arg4[%c0_8, %c0_9, %c0_10] : memref<1x1x8xf32, #tpu.memory_space<vmem>>, vector<1x1x8xf32>
    %7 = vector.shape_cast %6 : vector<1x1x8xf32> to vector<1x8xf32>
    %8 = vector.extract_strided_slice %1 {offsets = [0, 0], sizes = [8, 8], strides = [1, 1]} : vector<8x32xf32> to vector<8x8xf32>
    %9 = vector.extract_strided_slice %3 {offsets = [0, 0], sizes = [8, 8], strides = [1, 1]} : vector<8x32xf32> to vector<8x8xf32>
    %cst = arith.constant dense<0.000000e+00> : vector<8x8xf32>
    %10 = tpu.matmul %8, %9, %cst {dimension_numbers = #tpu.dot_dimension_numbers<[1], [1], [0], [0], [0, 0, 1, 0], [], []>} : vector<8x8xf32>, vector<8x8xf32>, vector<8x8xf32> -> vector<8x8xf32>
    %11 = vector.broadcast %7 : vector<1x8xf32> to vector<8x8xf32>
    %12 = arith.addf %10, %11 : vector<8x8xf32>
    %cst_11 = arith.constant dense<0xFF800000> : vector<8xf32>
    %13 = vector.multi_reduction <maximumf>, %12, %cst_11 [1] : vector<8x8xf32> to vector<8xf32>
    %14 = vector.shape_cast %13 : vector<8xf32> to vector<8x1xf32>
    %15 = vector.broadcast %14 : vector<8x1xf32> to vector<8x8xf32>
    %16 = arith.subf %12, %15 : vector<8x8xf32>
    %17 = math.exp %16 : vector<8x8xf32>
    %cst_12 = arith.constant dense<0.000000e+00> : vector<8xf32>
    %18 = vector.multi_reduction <add>, %17, %cst_12 [1] : vector<8x8xf32> to vector<8xf32>
    %19 = vector.shape_cast %18 : vector<8xf32> to vector<8x1xf32>
    %20 = tpu.reciprocal %19 {approx = true} : vector<8x1xf32> -> vector<8x1xf32>
    %21 = vector.broadcast %20 : vector<8x1xf32> to vector<8x8xf32>
    %22 = arith.mulf %17, %21 : vector<8x8xf32>
    %23 = vector.extract_strided_slice %5 {offsets = [0, 0], sizes = [8, 8], strides = [1, 1]} : vector<8x32xf32> to vector<8x8xf32>
    %cst_13 = arith.constant dense<0.000000e+00> : vector<8x8xf32>
    %24 = tpu.matmul %22, %23, %cst_13 {dimension_numbers = #tpu.dot_dimension_numbers<[1], [0], [0], [1], [0, 0, 1, 1], [], []>} : vector<8x8xf32>, vector<8x8xf32>, vector<8x8xf32> -> vector<8x8xf32>
    %c0_14 = arith.constant 0 : index
    %c0_15 = arith.constant 0 : index
    %c0_16 = arith.constant 0 : index
    %25 = vector.load %arg5[%c0_14, %c0_15, %c0_16] : memref<1x8x32xf32, #tpu.memory_space<vmem>>, vector<1x8x8xf32>
    %26 = vector.shape_cast %25 : vector<1x8x8xf32> to vector<8x8xf32>
    %27 = vector.shape_cast %24 : vector<8x8xf32> to vector<1x8x8xf32>
    tpu.vector_store %arg5[%c0_14, %c0_15, %c0_16], %27 {strides = array<i32>} : memref<1x8x32xf32, #tpu.memory_space<vmem>>, vector<1x8x8xf32>,
    %28 = vector.extract_strided_slice %1 {offsets = [0, 8], sizes = [8, 8], strides = [1, 1]} : vector<8x32xf32> to vector<8x8xf32>
    %29 = vector.extract_strided_slice %3 {offsets = [0, 8], sizes = [8, 8], strides = [1, 1]} : vector<8x32xf32> to vector<8x8xf32>
    %cst_17 = arith.constant dense<0.000000e+00> : vector<8x8xf32>
    %30 = tpu.matmul %28, %29, %cst_17 {dimension_numbers = #tpu.dot_dimension_numbers<[1], [1], [0], [0], [0, 0, 1, 0], [], []>} : vector<8x8xf32>, vector<8x8xf32>, vector<8x8xf32> -> vector<8x8xf32>
    %31 = vector.broadcast %7 : vector<1x8xf32> to vector<8x8xf32>
    %32 = arith.addf %30, %31 : vector<8x8xf32>
    %cst_18 = arith.constant dense<0xFF800000> : vector<8xf32>
    %33 = vector.multi_reduction <maximumf>, %32, %cst_18 [1] : vector<8x8xf32> to vector<8xf32>
    %34 = vector.shape_cast %33 : vector<8xf32> to vector<8x1xf32>
    %35 = vector.broadcast %34 : vector<8x1xf32> to vector<8x8xf32>
    %36 = arith.subf %32, %35 : vector<8x8xf32>
    %37 = math.exp %36 : vector<8x8xf32>
    %cst_19 = arith.constant dense<0.000000e+00> : vector<8xf32>
    %38 = vector.multi_reduction <add>, %37, %cst_19 [1] : vector<8x8xf32> to vector<8xf32>
    %39 = vector.shape_cast %38 : vector<8xf32> to vector<8x1xf32>
    %40 = tpu.reciprocal %39 {approx = true} : vector<8x1xf32> -> vector<8x1xf32>
    %41 = vector.broadcast %40 : vector<8x1xf32> to vector<8x8xf32>
    %42 = arith.mulf %37, %41 : vector<8x8xf32>
    %43 = vector.extract_strided_slice %5 {offsets = [0, 8], sizes = [8, 8], strides = [1, 1]} : vector<8x32xf32> to vector<8x8xf32>
    %cst_20 = arith.constant dense<0.000000e+00> : vector<8x8xf32>
    %44 = tpu.matmul %42, %43, %cst_20 {dimension_numbers = #tpu.dot_dimension_numbers<[1], [0], [0], [1], [0, 0, 1, 1], [], []>} : vector<8x8xf32>, vector<8x8xf32>, vector<8x8xf32> -> vector<8x8xf32>
    %c0_21 = arith.constant 0 : index
    %c0_22 = arith.constant 0 : index
    %c8 = arith.constant 8 : index
    %45 = vector.load %arg5[%c0_21, %c0_22, %c8] : memref<1x8x32xf32, #tpu.memory_space<vmem>>, vector<1x8x8xf32>
    %46 = vector.shape_cast %45 : vector<1x8x8xf32> to vector<8x8xf32>
    %47 = vector.shape_cast %44 : vector<8x8xf32> to vector<1x8x8xf32>
    tpu.vector_store %arg5[%c0_21, %c0_22, %c8], %47 {strides = array<i32>} : memref<1x8x32xf32, #tpu.memory_space<vmem>>, vector<1x8x8xf32>,
    %48 = vector.extract_strided_slice %1 {offsets = [0, 16], sizes = [8, 8], strides = [1, 1]} : vector<8x32xf32> to vector<8x8xf32>
    %49 = vector.extract_strided_slice %3 {offsets = [0, 16], sizes = [8, 8], strides = [1, 1]} : vector<8x32xf32> to vector<8x8xf32>
    %cst_23 = arith.constant dense<0.000000e+00> : vector<8x8xf32>
    %50 = tpu.matmul %48, %49, %cst_23 {dimension_numbers = #tpu.dot_dimension_numbers<[1], [1], [0], [0], [0, 0, 1, 0], [], []>} : vector<8x8xf32>, vector<8x8xf32>, vector<8x8xf32> -> vector<8x8xf32>
    %51 = vector.broadcast %7 : vector<1x8xf32> to vector<8x8xf32>
    %52 = arith.addf %50, %51 : vector<8x8xf32>
    %cst_24 = arith.constant dense<0xFF800000> : vector<8xf32>
    %53 = vector.multi_reduction <maximumf>, %52, %cst_24 [1] : vector<8x8xf32> to vector<8xf32>
    %54 = vector.shape_cast %53 : vector<8xf32> to vector<8x1xf32>
    %55 = vector.broadcast %54 : vector<8x1xf32> to vector<8x8xf32>
    %56 = arith.subf %52, %55 : vector<8x8xf32>
    %57 = math.exp %56 : vector<8x8xf32>
    %cst_25 = arith.constant dense<0.000000e+00> : vector<8xf32>
    %58 = vector.multi_reduction <add>, %57, %cst_25 [1] : vector<8x8xf32> to vector<8xf32>
    %59 = vector.shape_cast %58 : vector<8xf32> to vector<8x1xf32>
    %60 = tpu.reciprocal %59 {approx = true} : vector<8x1xf32> -> vector<8x1xf32>
    %61 = vector.broadcast %60 : vector<8x1xf32> to vector<8x8xf32>
    %62 = arith.mulf %57, %61 : vector<8x8xf32>
    %63 = vector.extract_strided_slice %5 {offsets = [0, 16], sizes = [8, 8], strides = [1, 1]} : vector<8x32xf32> to vector<8x8xf32>
    %cst_26 = arith.constant dense<0.000000e+00> : vector<8x8xf32>
    %64 = tpu.matmul %62, %63, %cst_26 {dimension_numbers = #tpu.dot_dimension_numbers<[1], [0], [0], [1], [0, 0, 1, 1], [], []>} : vector<8x8xf32>, vector<8x8xf32>, vector<8x8xf32> -> vector<8x8xf32>
    %c0_27 = arith.constant 0 : index
    %c0_28 = arith.constant 0 : index
    %c16 = arith.constant 16 : index
    %65 = vector.load %arg5[%c0_27, %c0_28, %c16] : memref<1x8x32xf32, #tpu.memory_space<vmem>>, vector<1x8x8xf32>
    %66 = vector.shape_cast %65 : vector<1x8x8xf32> to vector<8x8xf32>
    %67 = vector.shape_cast %64 : vector<8x8xf32> to vector<1x8x8xf32>
    tpu.vector_store %arg5[%c0_27, %c0_28, %c16], %67 {strides = array<i32>} : memref<1x8x32xf32, #tpu.memory_space<vmem>>, vector<1x8x8xf32>,
    %68 = vector.extract_strided_slice %1 {offsets = [0, 24], sizes = [8, 8], strides = [1, 1]} : vector<8x32xf32> to vector<8x8xf32>
    %69 = vector.extract_strided_slice %3 {offsets = [0, 24], sizes = [8, 8], strides = [1, 1]} : vector<8x32xf32> to vector<8x8xf32>
    %cst_29 = arith.constant dense<0.000000e+00> : vector<8x8xf32>
    %70 = tpu.matmul %68, %69, %cst_29 {dimension_numbers = #tpu.dot_dimension_numbers<[1], [1], [0], [0], [0, 0, 1, 0], [], []>} : vector<8x8xf32>, vector<8x8xf32>, vector<8x8xf32> -> vector<8x8xf32>
    %71 = vector.broadcast %7 : vector<1x8xf32> to vector<8x8xf32>
    %72 = arith.addf %70, %71 : vector<8x8xf32>
    %cst_30 = arith.constant dense<0xFF800000> : vector<8xf32>
    %73 = vector.multi_reduction <maximumf>, %72, %cst_30 [1] : vector<8x8xf32> to vector<8xf32>
    %74 = vector.shape_cast %73 : vector<8xf32> to vector<8x1xf32>
    %75 = vector.broadcast %74 : vector<8x1xf32> to vector<8x8xf32>
    %76 = arith.subf %72, %75 : vector<8x8xf32>
    %77 = math.exp %76 : vector<8x8xf32>
    %cst_31 = arith.constant dense<0.000000e+00> : vector<8xf32>
    %78 = vector.multi_reduction <add>, %77, %cst_31 [1] : vector<8x8xf32> to vector<8xf32>
    %79 = vector.shape_cast %78 : vector<8xf32> to vector<8x1xf32>
    %80 = tpu.reciprocal %79 {approx = true} : vector<8x1xf32> -> vector<8x1xf32>
    %81 = vector.broadcast %80 : vector<8x1xf32> to vector<8x8xf32>
    %82 = arith.mulf %77, %81 : vector<8x8xf32>
    %83 = vector.extract_strided_slice %5 {offsets = [0, 24], sizes = [8, 8], strides = [1, 1]} : vector<8x32xf32> to vector<8x8xf32>
    %cst_32 = arith.constant dense<0.000000e+00> : vector<8x8xf32>
    %84 = tpu.matmul %82, %83, %cst_32 {dimension_numbers = #tpu.dot_dimension_numbers<[1], [0], [0], [1], [0, 0, 1, 1], [], []>} : vector<8x8xf32>, vector<8x8xf32>, vector<8x8xf32> -> vector<8x8xf32>
    %c0_33 = arith.constant 0 : index
    %c0_34 = arith.constant 0 : index
    %c24 = arith.constant 24 : index
    %85 = vector.load %arg5[%c0_33, %c0_34, %c24] : memref<1x8x32xf32, #tpu.memory_space<vmem>>, vector<1x8x8xf32>
    %86 = vector.shape_cast %85 : vector<1x8x8xf32> to vector<8x8xf32>
    %87 = vector.shape_cast %84 : vector<8x8xf32> to vector<1x8x8xf32>
    tpu.vector_store %arg5[%c0_33, %c0_34, %c24], %87 {strides = array<i32>} : memref<1x8x32xf32, #tpu.memory_space<vmem>>, vector<1x8x8xf32>,
    return
  }
  func.func @transform_0(%arg0: i32) -> (i32, i32, i32) {
    %c0_i32 = arith.constant 0 : i32
    %c0_i32_0 = arith.constant 0 : i32
    %c0_i32_1 = arith.constant 0 : i32
    return %arg0, %c0_i32, %c0_i32_0 : i32, i32, i32
  }
  func.func @transform_1(%arg0: i32) -> (i32, i32, i32) {
    %c0_i32 = arith.constant 0 : i32
    %c0_i32_0 = arith.constant 0 : i32
    %c0_i32_1 = arith.constant 0 : i32
    return %arg0, %c0_i32, %c0_i32_0 : i32, i32, i32
  }
  func.func @transform_2(%arg0: i32) -> (i32, i32, i32) {
    %c0_i32 = arith.constant 0 : i32
    %c0_i32_0 = arith.constant 0 : i32
    %c0_i32_1 = arith.constant 0 : i32
    return %arg0, %c0_i32, %c0_i32_0 : i32, i32, i32
  }
  func.func @transform_3(%arg0: i32) -> (i32, i32, i32) {
    %c0_i32 = arith.constant 0 : i32
    %c0_i32_0 = arith.constant 0 : i32
    %c0_i32_1 = arith.constant 0 : i32
    return %arg0, %c0_i32, %c0_i32_0 : i32, i32, i32
  }
  func.func @transform_4(%arg0: i32) -> (i32, i32, i32) {
    %c0_i32 = arith.constant 0 : i32
    %c0_i32_0 = arith.constant 0 : i32
    %c0_i32_1 = arith.constant 0 : i32
    return %arg0, %c0_i32, %c0_i32_0 : i32, i32, i32
  }
}

module attributes {stable_mosaic.version = 11 : i64} {
  func.func @_proj_add_ln_kernel(%arg0: i32, %arg1: memref<16x32xf32, #tpu.memory_space<vmem>>, %arg2: memref<16x32xf32, #tpu.memory_space<vmem>>, %arg3: memref<32x32xf32, #tpu.memory_space<vmem>>, %arg4: memref<1x32xf32, #tpu.memory_space<vmem>>, %arg5: memref<1x32xf32, #tpu.memory_space<vmem>>, %arg6: memref<1x32xf32, #tpu.memory_space<vmem>>, %arg7: memref<16x32xf32, #tpu.memory_space<vmem>>) attributes {dimension_semantics = [#tpu.dimension_semantics<parallel>], iteration_bounds = array<i64: 1>, scalar_prefetch = 0 : i64, scratch_operands = 0 : i64, tpu.core_type = #tpu.core_type<tc>, window_params = [{transform_indices = @transform_0, window_bounds = array<i64: 16, 32>}, {transform_indices = @transform_1, window_bounds = array<i64: 16, 32>}, {pipeline_mode = #tpu.pipeline_mode<synchronous>, transform_indices = @transform_2, window_bounds = array<i64: 32, 32>}, {pipeline_mode = #tpu.pipeline_mode<synchronous>, transform_indices = @transform_3, window_bounds = array<i64: 1, 32>}, {pipeline_mode = #tpu.pipeline_mode<synchronous>, transform_indices = @transform_4, window_bounds = array<i64: 1, 32>}, {pipeline_mode = #tpu.pipeline_mode<synchronous>, transform_indices = @transform_5, window_bounds = array<i64: 1, 32>}, {transform_indices = @transform_6, window_bounds = array<i64: 16, 32>}]} {
    %c0 = arith.constant 0 : index
    %c0_0 = arith.constant 0 : index
    %0 = vector.load %arg1[%c0, %c0_0] : memref<16x32xf32, #tpu.memory_space<vmem>>, vector<16x32xf32>
    %c0_1 = arith.constant 0 : index
    %c0_2 = arith.constant 0 : index
    %1 = vector.load %arg2[%c0_1, %c0_2] : memref<16x32xf32, #tpu.memory_space<vmem>>, vector<16x32xf32>
    %c0_3 = arith.constant 0 : index
    %c0_4 = arith.constant 0 : index
    %2 = vector.load %arg3[%c0_3, %c0_4] : memref<32x32xf32, #tpu.memory_space<vmem>>, vector<32x32xf32>
    %cst = arith.constant dense<0.000000e+00> : vector<16x32xf32>
    %3 = tpu.matmul %0, %2, %cst {dimension_numbers = #tpu.dot_dimension_numbers<[1], [0], [0], [1], [0, 0, 1, 1], [], []>} : vector<16x32xf32>, vector<32x32xf32>, vector<16x32xf32> -> vector<16x32xf32>
    %4 = arith.addf %1, %3 : vector<16x32xf32>
    %c0_5 = arith.constant 0 : index
    %c0_6 = arith.constant 0 : index
    %5 = vector.load %arg4[%c0_5, %c0_6] : memref<1x32xf32, #tpu.memory_space<vmem>>, vector<1x32xf32>
    %6 = vector.broadcast %5 : vector<1x32xf32> to vector<16x32xf32>
    %7 = arith.addf %4, %6 : vector<16x32xf32>
    %cst_7 = arith.constant dense<0.000000e+00> : vector<16xf32>
    %8 = vector.multi_reduction <add>, %7, %cst_7 [1] : vector<16x32xf32> to vector<16xf32>
    %9 = vector.shape_cast %8 : vector<16xf32> to vector<16x1xf32>
    %cst_8 = arith.constant 3.200000e+01 : f32
    %10 = vector.broadcast %cst_8 : f32 to vector<16x1xf32>
    %11 = arith.divf %9, %10 : vector<16x1xf32>
    %12 = arith.mulf %7, %7 : vector<16x32xf32>
    %cst_9 = arith.constant dense<0.000000e+00> : vector<16xf32>
    %13 = vector.multi_reduction <add>, %12, %cst_9 [1] : vector<16x32xf32> to vector<16xf32>
    %14 = vector.shape_cast %13 : vector<16xf32> to vector<16x1xf32>
    %cst_10 = arith.constant 3.200000e+01 : f32
    %15 = vector.broadcast %cst_10 : f32 to vector<16x1xf32>
    %16 = arith.divf %14, %15 : vector<16x1xf32>
    %17 = arith.mulf %11, %11 : vector<16x1xf32>
    %18 = arith.subf %16, %17 : vector<16x1xf32>
    %19 = vector.broadcast %11 : vector<16x1xf32> to vector<16x32xf32>
    %20 = arith.subf %7, %19 : vector<16x32xf32>
    %cst_11 = arith.constant 9.99999974E-6 : f32
    %21 = vector.broadcast %cst_11 : f32 to vector<16x1xf32>
    %22 = arith.addf %18, %21 : vector<16x1xf32>
    %23 = math.rsqrt %22 : vector<16x1xf32>
    %24 = vector.broadcast %23 : vector<16x1xf32> to vector<16x32xf32>
    %25 = arith.mulf %20, %24 : vector<16x32xf32>
    %c0_12 = arith.constant 0 : index
    %c0_13 = arith.constant 0 : index
    %26 = vector.load %arg5[%c0_12, %c0_13] : memref<1x32xf32, #tpu.memory_space<vmem>>, vector<1x32xf32>
    %27 = vector.broadcast %26 : vector<1x32xf32> to vector<16x32xf32>
    %28 = arith.mulf %25, %27 : vector<16x32xf32>
    %c0_14 = arith.constant 0 : index
    %c0_15 = arith.constant 0 : index
    %29 = vector.load %arg6[%c0_14, %c0_15] : memref<1x32xf32, #tpu.memory_space<vmem>>, vector<1x32xf32>
    %30 = vector.broadcast %29 : vector<1x32xf32> to vector<16x32xf32>
    %31 = arith.addf %28, %30 : vector<16x32xf32>
    %c0_16 = arith.constant 0 : index
    %c0_17 = arith.constant 0 : index
    %32 = vector.load %arg7[%c0_16, %c0_17] : memref<16x32xf32, #tpu.memory_space<vmem>>, vector<16x32xf32>
    tpu.vector_store %arg7[%c0_16, %c0_17], %31 {strides = array<i32>} : memref<16x32xf32, #tpu.memory_space<vmem>>, vector<16x32xf32>,
    return
  }
  func.func @transform_0(%arg0: i32) -> (i32, i32) {
    %c0_i32 = arith.constant 0 : i32
    %c0_i32_0 = arith.constant 0 : i32
    return %arg0, %c0_i32 : i32, i32
  }
  func.func @transform_1(%arg0: i32) -> (i32, i32) {
    %c0_i32 = arith.constant 0 : i32
    %c0_i32_0 = arith.constant 0 : i32
    return %arg0, %c0_i32 : i32, i32
  }
  func.func @transform_2(%arg0: i32) -> (i32, i32) {
    %c0_i32 = arith.constant 0 : i32
    %c0_i32_0 = arith.constant 0 : i32
    %c0_i32_1 = arith.constant 0 : i32
    return %c0_i32, %c0_i32_0 : i32, i32
  }
  func.func @transform_3(%arg0: i32) -> (i32, i32) {
    %c0_i32 = arith.constant 0 : i32
    %c0_i32_0 = arith.constant 0 : i32
    %c0_i32_1 = arith.constant 0 : i32
    return %c0_i32, %c0_i32_0 : i32, i32
  }
  func.func @transform_4(%arg0: i32) -> (i32, i32) {
    %c0_i32 = arith.constant 0 : i32
    %c0_i32_0 = arith.constant 0 : i32
    %c0_i32_1 = arith.constant 0 : i32
    return %c0_i32, %c0_i32_0 : i32, i32
  }
  func.func @transform_5(%arg0: i32) -> (i32, i32) {
    %c0_i32 = arith.constant 0 : i32
    %c0_i32_0 = arith.constant 0 : i32
    %c0_i32_1 = arith.constant 0 : i32
    return %c0_i32, %c0_i32_0 : i32, i32
  }
  func.func @transform_6(%arg0: i32) -> (i32, i32) {
    %c0_i32 = arith.constant 0 : i32
    %c0_i32_0 = arith.constant 0 : i32
    return %arg0, %c0_i32 : i32, i32
  }
}

module attributes {stable_mosaic.version = 11 : i64} {
  func.func @_ffn_add_ln_kernel(%arg0: i32, %arg1: memref<16x32xf32, #tpu.memory_space<vmem>>, %arg2: memref<32x64xf32, #tpu.memory_space<vmem>>, %arg3: memref<1x64xf32, #tpu.memory_space<vmem>>, %arg4: memref<64x32xf32, #tpu.memory_space<vmem>>, %arg5: memref<1x32xf32, #tpu.memory_space<vmem>>, %arg6: memref<1x32xf32, #tpu.memory_space<vmem>>, %arg7: memref<1x32xf32, #tpu.memory_space<vmem>>, %arg8: memref<16x32xf32, #tpu.memory_space<vmem>>) attributes {dimension_semantics = [#tpu.dimension_semantics<parallel>], iteration_bounds = array<i64: 1>, scalar_prefetch = 0 : i64, scratch_operands = 0 : i64, tpu.core_type = #tpu.core_type<tc>, window_params = [{transform_indices = @transform_0, window_bounds = array<i64: 16, 32>}, {pipeline_mode = #tpu.pipeline_mode<synchronous>, transform_indices = @transform_1, window_bounds = array<i64: 32, 64>}, {pipeline_mode = #tpu.pipeline_mode<synchronous>, transform_indices = @transform_2, window_bounds = array<i64: 1, 64>}, {pipeline_mode = #tpu.pipeline_mode<synchronous>, transform_indices = @transform_3, window_bounds = array<i64: 64, 32>}, {pipeline_mode = #tpu.pipeline_mode<synchronous>, transform_indices = @transform_4, window_bounds = array<i64: 1, 32>}, {pipeline_mode = #tpu.pipeline_mode<synchronous>, transform_indices = @transform_5, window_bounds = array<i64: 1, 32>}, {pipeline_mode = #tpu.pipeline_mode<synchronous>, transform_indices = @transform_6, window_bounds = array<i64: 1, 32>}, {transform_indices = @transform_7, window_bounds = array<i64: 16, 32>}]} {
    %c0 = arith.constant 0 : index
    %c0_0 = arith.constant 0 : index
    %0 = vector.load %arg1[%c0, %c0_0] : memref<16x32xf32, #tpu.memory_space<vmem>>, vector<16x32xf32>
    %c0_1 = arith.constant 0 : index
    %c0_2 = arith.constant 0 : index
    %1 = vector.load %arg2[%c0_1, %c0_2] : memref<32x64xf32, #tpu.memory_space<vmem>>, vector<32x64xf32>
    %cst = arith.constant dense<0.000000e+00> : vector<16x64xf32>
    %2 = tpu.matmul %0, %1, %cst {dimension_numbers = #tpu.dot_dimension_numbers<[1], [0], [0], [1], [0, 0, 1, 1], [], []>} : vector<16x32xf32>, vector<32x64xf32>, vector<16x64xf32> -> vector<16x64xf32>
    %c0_3 = arith.constant 0 : index
    %c0_4 = arith.constant 0 : index
    %3 = vector.load %arg3[%c0_3, %c0_4] : memref<1x64xf32, #tpu.memory_space<vmem>>, vector<1x64xf32>
    %4 = vector.broadcast %3 : vector<1x64xf32> to vector<16x64xf32>
    %5 = arith.addf %2, %4 : vector<16x64xf32>
    %cst_5 = arith.constant 0.000000e+00 : f32
    %6 = vector.broadcast %cst_5 : f32 to vector<16x64xf32>
    %7 = arith.maximumf %5, %6 : vector<16x64xf32>
    %c0_6 = arith.constant 0 : index
    %c0_7 = arith.constant 0 : index
    %8 = vector.load %arg4[%c0_6, %c0_7] : memref<64x32xf32, #tpu.memory_space<vmem>>, vector<64x32xf32>
    %cst_8 = arith.constant dense<0.000000e+00> : vector<16x32xf32>
    %9 = tpu.matmul %7, %8, %cst_8 {dimension_numbers = #tpu.dot_dimension_numbers<[1], [0], [0], [1], [0, 0, 1, 1], [], []>} : vector<16x64xf32>, vector<64x32xf32>, vector<16x32xf32> -> vector<16x32xf32>
    %10 = arith.addf %0, %9 : vector<16x32xf32>
    %c0_9 = arith.constant 0 : index
    %c0_10 = arith.constant 0 : index
    %11 = vector.load %arg5[%c0_9, %c0_10] : memref<1x32xf32, #tpu.memory_space<vmem>>, vector<1x32xf32>
    %12 = vector.broadcast %11 : vector<1x32xf32> to vector<16x32xf32>
    %13 = arith.addf %10, %12 : vector<16x32xf32>
    %cst_11 = arith.constant dense<0.000000e+00> : vector<16xf32>
    %14 = vector.multi_reduction <add>, %13, %cst_11 [1] : vector<16x32xf32> to vector<16xf32>
    %15 = vector.shape_cast %14 : vector<16xf32> to vector<16x1xf32>
    %cst_12 = arith.constant 3.200000e+01 : f32
    %16 = vector.broadcast %cst_12 : f32 to vector<16x1xf32>
    %17 = arith.divf %15, %16 : vector<16x1xf32>
    %18 = arith.mulf %13, %13 : vector<16x32xf32>
    %cst_13 = arith.constant dense<0.000000e+00> : vector<16xf32>
    %19 = vector.multi_reduction <add>, %18, %cst_13 [1] : vector<16x32xf32> to vector<16xf32>
    %20 = vector.shape_cast %19 : vector<16xf32> to vector<16x1xf32>
    %cst_14 = arith.constant 3.200000e+01 : f32
    %21 = vector.broadcast %cst_14 : f32 to vector<16x1xf32>
    %22 = arith.divf %20, %21 : vector<16x1xf32>
    %23 = arith.mulf %17, %17 : vector<16x1xf32>
    %24 = arith.subf %22, %23 : vector<16x1xf32>
    %25 = vector.broadcast %17 : vector<16x1xf32> to vector<16x32xf32>
    %26 = arith.subf %13, %25 : vector<16x32xf32>
    %cst_15 = arith.constant 9.99999974E-6 : f32
    %27 = vector.broadcast %cst_15 : f32 to vector<16x1xf32>
    %28 = arith.addf %24, %27 : vector<16x1xf32>
    %29 = math.rsqrt %28 : vector<16x1xf32>
    %30 = vector.broadcast %29 : vector<16x1xf32> to vector<16x32xf32>
    %31 = arith.mulf %26, %30 : vector<16x32xf32>
    %c0_16 = arith.constant 0 : index
    %c0_17 = arith.constant 0 : index
    %32 = vector.load %arg6[%c0_16, %c0_17] : memref<1x32xf32, #tpu.memory_space<vmem>>, vector<1x32xf32>
    %33 = vector.broadcast %32 : vector<1x32xf32> to vector<16x32xf32>
    %34 = arith.mulf %31, %33 : vector<16x32xf32>
    %c0_18 = arith.constant 0 : index
    %c0_19 = arith.constant 0 : index
    %35 = vector.load %arg7[%c0_18, %c0_19] : memref<1x32xf32, #tpu.memory_space<vmem>>, vector<1x32xf32>
    %36 = vector.broadcast %35 : vector<1x32xf32> to vector<16x32xf32>
    %37 = arith.addf %34, %36 : vector<16x32xf32>
    %c0_20 = arith.constant 0 : index
    %c0_21 = arith.constant 0 : index
    %38 = vector.load %arg8[%c0_20, %c0_21] : memref<16x32xf32, #tpu.memory_space<vmem>>, vector<16x32xf32>
    tpu.vector_store %arg8[%c0_20, %c0_21], %37 {strides = array<i32>} : memref<16x32xf32, #tpu.memory_space<vmem>>, vector<16x32xf32>,
    return
  }
  func.func @transform_0(%arg0: i32) -> (i32, i32) {
    %c0_i32 = arith.constant 0 : i32
    %c0_i32_0 = arith.constant 0 : i32
    return %arg0, %c0_i32 : i32, i32
  }
  func.func @transform_1(%arg0: i32) -> (i32, i32) {
    %c0_i32 = arith.constant 0 : i32
    %c0_i32_0 = arith.constant 0 : i32
    %c0_i32_1 = arith.constant 0 : i32
    return %c0_i32, %c0_i32_0 : i32, i32
  }
  func.func @transform_2(%arg0: i32) -> (i32, i32) {
    %c0_i32 = arith.constant 0 : i32
    %c0_i32_0 = arith.constant 0 : i32
    %c0_i32_1 = arith.constant 0 : i32
    return %c0_i32, %c0_i32_0 : i32, i32
  }
  func.func @transform_3(%arg0: i32) -> (i32, i32) {
    %c0_i32 = arith.constant 0 : i32
    %c0_i32_0 = arith.constant 0 : i32
    %c0_i32_1 = arith.constant 0 : i32
    return %c0_i32, %c0_i32_0 : i32, i32
  }
  func.func @transform_4(%arg0: i32) -> (i32, i32) {
    %c0_i32 = arith.constant 0 : i32
    %c0_i32_0 = arith.constant 0 : i32
    %c0_i32_1 = arith.constant 0 : i32
    return %c0_i32, %c0_i32_0 : i32, i32
  }
  func.func @transform_5(%arg0: i32) -> (i32, i32) {
    %c0_i32 = arith.constant 0 : i32
    %c0_i32_0 = arith.constant 0 : i32
    %c0_i32_1 = arith.constant 0 : i32
    return %c0_i32, %c0_i32_0 : i32, i32
  }
  func.func @transform_6(%arg0: i32) -> (i32, i32) {
    %c0_i32 = arith.constant 0 : i32
    %c0_i32_0 = arith.constant 0 : i32
    %c0_i32_1 = arith.constant 0 : i32
    return %c0_i32, %c0_i32_0 : i32, i32
  }
  func.func @transform_7(%arg0: i32) -> (i32, i32) {
    %c0_i32 = arith.constant 0 : i32
    %c0_i32_0 = arith.constant 0 : i32
    return %arg0, %c0_i32 : i32, i32
  }
}

module attributes {stable_mosaic.version = 11 : i64} {
  func.func @_linear_kernel(%arg0: i32, %arg1: memref<32x32xf32, #tpu.memory_space<vmem>>, %arg2: memref<32x4xf32, #tpu.memory_space<vmem>>, %arg3: memref<1x4xf32, #tpu.memory_space<vmem>>, %arg4: memref<32x4xf32, #tpu.memory_space<vmem>>) attributes {dimension_semantics = [#tpu.dimension_semantics<parallel>], iteration_bounds = array<i64: 1>, scalar_prefetch = 0 : i64, scratch_operands = 0 : i64, tpu.core_type = #tpu.core_type<tc>, window_params = [{transform_indices = @transform_0, window_bounds = array<i64: 32, 32>}, {pipeline_mode = #tpu.pipeline_mode<synchronous>, transform_indices = @transform_1, window_bounds = array<i64: 32, 4>}, {pipeline_mode = #tpu.pipeline_mode<synchronous>, transform_indices = @transform_2, window_bounds = array<i64: 1, 4>}, {transform_indices = @transform_3, window_bounds = array<i64: 32, 4>}]} {
    %c0 = arith.constant 0 : index
    %c0_0 = arith.constant 0 : index
    %0 = vector.load %arg1[%c0, %c0_0] : memref<32x32xf32, #tpu.memory_space<vmem>>, vector<32x32xf32>
    %c0_1 = arith.constant 0 : index
    %c0_2 = arith.constant 0 : index
    %1 = vector.load %arg2[%c0_1, %c0_2] : memref<32x4xf32, #tpu.memory_space<vmem>>, vector<32x4xf32>
    %cst = arith.constant dense<0.000000e+00> : vector<32x4xf32>
    %2 = tpu.matmul %0, %1, %cst {dimension_numbers = #tpu.dot_dimension_numbers<[1], [0], [0], [1], [0, 0, 1, 1], [], []>} : vector<32x32xf32>, vector<32x4xf32>, vector<32x4xf32> -> vector<32x4xf32>
    %c0_3 = arith.constant 0 : index
    %c0_4 = arith.constant 0 : index
    %3 = vector.load %arg3[%c0_3, %c0_4] : memref<1x4xf32, #tpu.memory_space<vmem>>, vector<1x4xf32>
    %4 = vector.broadcast %3 : vector<1x4xf32> to vector<32x4xf32>
    %5 = arith.addf %2, %4 : vector<32x4xf32>
    %c0_5 = arith.constant 0 : index
    %c0_6 = arith.constant 0 : index
    %6 = vector.load %arg4[%c0_5, %c0_6] : memref<32x4xf32, #tpu.memory_space<vmem>>, vector<32x4xf32>
    tpu.vector_store %arg4[%c0_5, %c0_6], %5 {strides = array<i32>} : memref<32x4xf32, #tpu.memory_space<vmem>>, vector<32x4xf32>,
    return
  }
  func.func @transform_0(%arg0: i32) -> (i32, i32) {
    %c0_i32 = arith.constant 0 : i32
    %c0_i32_0 = arith.constant 0 : i32
    return %arg0, %c0_i32 : i32, i32
  }
  func.func @transform_1(%arg0: i32) -> (i32, i32) {
    %c0_i32 = arith.constant 0 : i32
    %c0_i32_0 = arith.constant 0 : i32
    %c0_i32_1 = arith.constant 0 : i32
    return %c0_i32, %c0_i32_0 : i32, i32
  }
  func.func @transform_2(%arg0: i32) -> (i32, i32) {
    %c0_i32 = arith.constant 0 : i32
    %c0_i32_0 = arith.constant 0 : i32
    %c0_i32_1 = arith.constant 0 : i32
    return %c0_i32, %c0_i32_0 : i32, i32
  }
  func.func @transform_3(%arg0: i32) -> (i32, i32) {
    %c0_i32 = arith.constant 0 : i32
    %c0_i32_0 = arith.constant 0 : i32
    return %arg0, %c0_i32 : i32, i32
  }
}

</mosaic_0001>

<bundles_post_ra>
// kernel: mot_interp_forward.24
= control target key start
LH: loop header
LB: loop body
LE: loop exit
PB: predicated region body
PF: predicated region fallthrough
CT: control target
= control target key end

     0   :  { %vm39_vm0 = vcmask 1043456   ;;  %vm26_vm1 = vcmask 31744   ;;  %vm128_vm2 = vcmask 261120   ;;  %s208_s1 = inlined_call_operand.vmem [shape: f32[4,32], index: 1, kind: input, shape index: {}]   ;;  %s209_s0 = inlined_call_operand.vmem [shape: f32[32,4], index: 0, kind: input, shape index: {}]   ;;  %s210_s2 = inlined_call_operand.vmem [shape: f32[1,32], index: 2, kind: input, shape index: {}]   ;;  %s211_s3 = inlined_call_operand.vmem [shape: f32[32,32], index: 3, kind: output, shape index: {}]  }
   0x1   :  { %v18_v0 = vld [vmem:[%s208_s1] sm:$0xf]  ;;  %v16_v2 = vld [vmem:[%s209_s0 + $0x10] sm:$0xff]  ;;  %v15_v3 = vld [vmem:[%s209_s0 + $0x8] sm:$0xff] }
   0x2   :  { %v14_v1 = vld [vmem:[%s209_s0] sm:$0xff]  ;;  %148 = vmatprep.subr.msk.mxu0 %vm39_vm0, %v18_v0  ;;  %156 = vmatprep.subr.msk.mxu1 %vm39_vm0, %v18_v0  ;;  %v17_v4 = vld [vmem:[%s209_s0 + $0x18] sm:$0xff] }
   0x3   :  { %149 = vmatpush3.msk.msra.mxu0 %vm39_vm0, %v18_v0  ;;  %157 = vmatpush3.msk.msra.mxu1 %vm39_vm0, %v18_v0  ;;  %v137_v5 = vld [vmem:[%s210_s2] ss:$0 sm:$0xff] }
   0x4   :  { %150 = vmatprep.mubr.msk.f32.mxu0 %vm26_vm1, %v14_v1  ;;  %153 = vmatprep.mubr.msk.f32.mxu1 %vm26_vm1, %v16_v2 }
   0x5   :  { %151 = vmatmul.mubr.msk.f32.vlgmr.msra.gmra.mrb[0].mxu0 %vm26_vm1, %v15_v3  ;;  %154 = vmatmul.mubr.msk.f32.vlgmr.msra.gmra.mrb[0].mxu1 %vm26_vm1, %v17_v4 }
  0xd8   :  { %v152_v6 = vpop.f32.mrb[0].mxu0  ;;  %v155_v7 = vpop.f32.mrb[0].mxu1 }
  0xd9   :  { %v115_v8 = vadd.f32 %v152_v6, %v137_v5  ;;  %v125_v9 = vadd.f32 %v155_v7, %v137_v5  ;;  %v109_v10 = vpop.f32.mrb[1].mxu0  ;;  %v119_v11 = vpop.f32.mrb[1].mxu1 }
  0xda   :  { %v110_v12 = vadd.f32 %v137_v5, %v109_v10  ;;  %v120_v13 = vadd.f32 %v137_v5, %v119_v11 }
  0xdb   :  { %130 = vst.msk [vmem:[%s211_s3 + $0x8] sm:$0xff] %vm128_vm2, %v115_v8  ;;  %132 = vst.msk [vmem:[%s211_s3 + $0x18] sm:$0xff] %vm128_vm2, %v125_v9 }
  0xdc   :  { %129 = vst.msk [vmem:[%s211_s3] sm:$0xff] %vm128_vm2, %v110_v12  ;;  %131 = vst.msk [vmem:[%s211_s3 + $0x10] sm:$0xff] %vm128_vm2, %v120_v13 }

// kernel: mot_interp_forward.25
= control target key start
LH: loop header
LB: loop body
LE: loop exit
PB: predicated region body
PF: predicated region fallthrough
CT: control target
= control target key end

     0   :  { %vm49_vm0 = vcmask 261120   ;;  %s451_s19 = smov 96   ;;  %s567_s4 = inlined_call_operand.vmem [shape: f32[32,96], index: 4, kind: input, shape index: {}]   ;;  %s568_s0 = inlined_call_operand.vmem [shape: f32[16,32], index: 0, kind: input, shape index: {}, may-alias: {0,1}]   ;;  %s569_s2 = inlined_call_operand.vmem [shape: f32[16,32], index: 2, kind: input, shape index: {}, may-alias: {2,3}]   ;;  %s570_s1 = inlined_call_operand.vmem [shape: f32[16,32], index: 1, kind: input, shape index: {}, may-alias: {0,1}]   ;;  %s571_s3 = inlined_call_operand.vmem [shape: f32[16,32], index: 3, kind: input, shape index: {}, may-alias: {2,3}]   ;;  %s572_s5 = inlined_call_operand.vmem [shape: f32[1,96], index: 5, kind: input, shape index: {}]   ;;  %s573_s6 = inlined_call_operand.vmem [shape: f32[16,32], index: 6, kind: output, shape index: {0}]   ;;  %s574_s7 = inlined_call_operand.vmem [shape: f32[16,32], index: 7, kind: output, shape index: {1}]   ;;  %s575_s8 = inlined_call_operand.vmem [shape: f32[16,32], index: 8, kind: output, shape index: {2}]  }
   0x1   :  { %v38_v0 = vld [vmem:[%s567_s4] sm:$0xff]  ;;  %v39_v1 = vld [vmem:[%s567_s4 + $0x8] sm:$0xff]  ;;  %v40_v2 = vld [vmem:[%s567_s4 + $0x10] sm:$0xff] }
   0x2   :  { %v431_v3 = vpack.i.bf16 %v39_v1, %v38_v0  ;;  %v41_v4 = vld [vmem:[%s567_s4 + $0x18] sm:$0xff]  ;;  %v405_v5 = vpack.c.bf16 %v39_v1, %v38_v0  ;;  %v26_v6 = vld [vmem:[%s568_s0] sm:$0xff]  ;;  %v29_v12 = vld [vmem:[%s570_s1 + $0x8] sm:$0xff] }
   0x3   :  { %v441_v7 = vpack.i.bf16 %v41_v4, %v40_v2  ;;  %v409_v8 = vpack.c.bf16 %v41_v4, %v40_v2  ;;  %v30_v9 = vld [vmem:[%s569_s2] sm:$0xff]  ;;  %v35_v14 = vld [vmem:[%s571_s3 + $0x8] sm:$0xff] }
   0x4   :  { %v28_v10 = vld [vmem:[%s570_s1] sm:$0xff]  ;;  %432 = vrot.lane.b32.xlu0 %v431_v3, %s451_s19  ;;  %406 = vmatprep.subr.bf16.mxu0 %v405_v5  ;;  %v32_v11 = vadd.f32 %v30_v9, %v26_v6  ;;  %v27_v15 = vld [vmem:[%s568_s0 + $0x8] sm:$0xff]  ;;  %v37_v18 = vadd.f32 %v35_v14, %v29_v12  ;;  %s452_s1 = smov 64  }
   0x5   :  { %v34_v13 = vld [vmem:[%s571_s3] sm:$0xff]  ;;  %442 = vrot.lane.b32.xlu1 %v441_v7, %s451_s19  ;;  %408 = vmatpush3.bf16.msra.mxu0 %v405_v5  ;;  %v31_v16 = vld [vmem:[%s569_s2 + $0x8] sm:$0xff] }
   0x6   :  { %v36_v17 = vadd.f32 %v34_v13, %v28_v10  ;;  %410 = vmatprep.subr.bf16.mxu0 %v409_v8  ;;  %380 = vmatprep.mubr.msk.f32.mxu0 %vm49_vm0, %v32_v11  ;;  %v33_v19 = vadd.f32 %v31_v16, %v27_v15  ;;  %v347_v20 = vld [vmem:[%s572_s5] ss:$0 sm:$0xff] }
   0x8   :  { %391 = vmatprep.mubr.msk.f32.mxu1 %vm49_vm0, %v36_v17  ;;  %437 = vrot.lane.b32.xlu0 %v431_v3, %s452_s1 }
   0x9   :  { %447 = vrot.lane.b32.xlu1 %v441_v7, %s452_s1  ;;  %412 = vmatpush3.bf16.msra.mxu0 %v409_v8 }
   0xc   :  { %381 = vmatmul.mubr.msk.f32.vlgmr.msra.gmra.mrb[0].mxu0 %vm49_vm0, %v33_v19  ;;  %147 = vrot.lane.b32.xlu0 %v347_v20, %s451_s19 }
   0xd   :  { %402 = vmatprep.mubr.msk.f32.mxu0 %vm49_vm0, %v28_v10  ;;  %243 = vrot.lane.b32.xlu1 %v347_v20, %s452_s1 }
  0x76   :  { %v433_v21 = vpop.permute.xlu0 %432 }
  0x77   :  { %v435_v22 = vunpack.i.h.bf16 %v433_v21  ;;  %v434_v23 = vunpack.i.l.bf16 %v433_v21  ;;  %v443_v24 = vpop.permute.xlu1 %442 }
  0x78   :  { %v445_v25 = vunpack.i.h.bf16 %v443_v24  ;;  %v444_v26 = vunpack.i.l.bf16 %v443_v24 }
  0x79   :  { %v413_v27 = vpack.c.bf16 %v435_v22, %v434_v23 }
  0x7a   :  { %v417_v28 = vpack.c.bf16 %v445_v25, %v444_v26  ;;  %v438_v29 = vpop.permute.xlu0 %437 }
  0x7b   :  { %v440_v30 = vunpack.i.h.bf16 %v438_v29  ;;  %v439_v31 = vunpack.i.l.bf16 %v438_v29  ;;  %414 = vmatprep.subr.bf16.mxu1 %v413_v27  ;;  %v448_v32 = vpop.permute.xlu1 %447 }
  0x7c   :  { %416 = vmatpush3.bf16.msra.mxu1 %v413_v27  ;;  %v450_v33 = vunpack.i.h.bf16 %v448_v32  ;;  %v449_v34 = vunpack.i.l.bf16 %v448_v32 }
  0x7d   :  { %v421_v35 = vpack.c.bf16 %v440_v30, %v439_v31  ;;  %418 = vmatprep.subr.bf16.mxu1 %v417_v28 }
  0x7e   :  { %v425_v36 = vpack.c.bf16 %v450_v33, %v449_v34  ;;  %v148_v43 = vpop.permute.xlu0 %147 }
  0x7f   :  { %422 = vmatprep.subr.bf16.mxu0 %v421_v35  ;;  %v244_v47 = vpop.permute.xlu1 %243 }
  0x80   :  { %420 = vmatpush3.bf16.msra.mxu1 %v417_v28  ;;  %424 = vmatpush3.bf16.msra.mxu0 %v421_v35 }
  0x81   :  { %426 = vmatprep.subr.bf16.mxu0 %v425_v36 }
  0x83   :  { %392 = vmatmul.mubr.msk.f32.vlgmr.msra.gmra.mrb[0].mxu1 %vm49_vm0, %v37_v18 }
  0x84   :  { %428 = vmatpush3.bf16.msra.mxu0 %v425_v36 }
  0x87   :  { %403 = vmatmul.mubr.msk.f32.vlgmr.msra.gmra.mrb[2].mxu0 %vm49_vm0, %v29_v12 }
  0xdf   :  { %v382_v37 = vpop.f32.mrb[0].mxu0 }
  0xe0   :  { %v128_v38 = vadd.f32 %v382_v37, %v347_v20  ;;  %v122_v39 = vpop.f32.mrb[1].mxu0 }
  0xe1   :  { %v123_v40 = vadd.f32 %v347_v20, %v122_v39 }
  0xe2   :  { %v328_v41 = vmul.f32 0.35355338, %v128_v38 }
  0xe3   :  { %v327_v42 = vmul.f32 0.35355338, %v123_v40 }
  0xe4   :  { %330 = vst.msk [vmem:[%s573_s6 + $0x8] sm:$0xff] %vm49_vm0, %v328_v41 }
  0xe5   :  { %329 = vst.msk [vmem:[%s573_s6] sm:$0xff] %vm49_vm0, %v327_v42 }
 0x156   :  { %v393_v44 = vpop.f32.mrb[0].mxu1 }
 0x157   :  { %v228_v45 = vadd.f32 %v393_v44, %v148_v43  ;;  %v222_v46 = vpop.f32.mrb[1].mxu1 }
 0x158   :  { %v223_v48 = vadd.f32 %v222_v46, %v148_v43 }
 0x159   :  { %332 = vst.msk [vmem:[%s574_s7 + $0x8] sm:$0xff] %vm49_vm0, %v228_v45 }
 0x15a   :  { %331 = vst.msk [vmem:[%s574_s7] sm:$0xff] %vm49_vm0, %v223_v48  ;;  %v404_v49 = vpop.f32.mrb[2].mxu0 }
 0x15b   :  { %v324_v50 = vadd.f32 %v404_v49, %v244_v47  ;;  %v318_v51 = vpop.f32.mrb[3].mxu0 }
 0x15c   :  { %v319_v52 = vadd.f32 %v318_v51, %v244_v47 }
 0x15d   :  { %334 = vst.msk [vmem:[%s575_s8 + $0x8] sm:$0xff] %vm49_vm0, %v324_v50 }
 0x15e   :  { %333 = vst.msk [vmem:[%s575_s8] sm:$0xff] %vm49_vm0, %v319_v52 }

// kernel: mot_interp_forward.27
= control target key start
LH: loop header
LB: loop body
LE: loop exit
PB: predicated region body
PF: predicated region fallthrough
CT: control target
= control target key end

     0   :  { %vm31_vm0 = vcmask 261120   ;;  %s295_s2 = inlined_call_operand.vmem [shape: f32[32,32], index: 2, kind: input, shape index: {}]   ;;  %s296_s0 = inlined_call_operand.vmem [shape: f32[16,32], index: 0, kind: input, shape index: {}]   ;;  %s297_s1 = inlined_call_operand.vmem [shape: f32[16,32], index: 1, kind: input, shape index: {}]   ;;  %s298_s3 = inlined_call_operand.vmem [shape: f32[1,32], index: 3, kind: input, shape index: {}]   ;;  %s299_s4 = inlined_call_operand.vmem [shape: f32[1,32], index: 4, kind: input, shape index: {}]   ;;  %s300_s5 = inlined_call_operand.vmem [shape: f32[1,32], index: 5, kind: input, shape index: {}]   ;;  %s301_s6 = inlined_call_operand.vmem [shape: f32[16,32], index: 6, kind: output, shape index: {}]  }
   0x1   :  { %v27_v0 = vld [vmem:[%s295_s2] sm:$0xff]  ;;  %v28_v1 = vld [vmem:[%s295_s2 + $0x8] sm:$0xff]  ;;  %v29_v2 = vld [vmem:[%s295_s2 + $0x10] sm:$0xff] }
   0x2   :  { %v201_v3 = vpack.c.bf16 %v28_v1, %v27_v0  ;;  %v30_v4 = vld [vmem:[%s295_s2 + $0x18] sm:$0xff]  ;;  %v23_v5 = vld [vmem:[%s296_s0] sm:$0xff]  ;;  %v24_v7 = vld [vmem:[%s296_s0 + $0x8] sm:$0xff] }
   0x3   :  { %v205_v6 = vpack.c.bf16 %v30_v4, %v29_v2  ;;  %198 = vmatprep.mubr.msk.f32.mxu0 %vm31_vm0, %v23_v5  ;;  %v26_v8 = vld [vmem:[%s297_s1 + $0x8] sm:$0xff]  ;;  %v25_v9 = vld [vmem:[%s297_s1] sm:$0xff] }
   0x4   :  { %202 = vmatprep.subr.bf16.mxu0 %v201_v3  ;;  %v181_v12 = vld [vmem:[%s298_s3] ss:$0 sm:$0xff] }
   0x5   :  { %204 = vmatpush3.bf16.msra.mxu0 %v201_v3  ;;  %v182_v39 = vld [vmem:[%s299_s4] ss:$0 sm:$0xff] }
   0x6   :  { %206 = vmatprep.subr.bf16.mxu0 %v205_v6  ;;  %v183_v41 = vld [vmem:[%s300_s5] ss:$0 sm:$0xff] }
   0x9   :  { %208 = vmatpush3.bf16.msra.mxu0 %v205_v6 }
   0xc   :  { %199 = vmatmul.mubr.msk.f32.vlgmr.msra.gmra.mrb[0].mxu0 %vm31_vm0, %v24_v7 }
  0xdf   :  { %v200_v10 = vpop.f32.mrb[0].mxu0 }
  0xe0   :  { %v114_v11 = vadd.f32 %v200_v10, %v26_v8  ;;  %v104_v13 = vpop.f32.mrb[1].mxu0 }
  0xe1   :  { %v113_v14 = vadd.f32 %v104_v13, %v25_v9 }
  0xe2   :  { %v123_v15 = vadd.f32 %v181_v12, %v114_v11 }
  0xe3   :  { %v122_v16 = vadd.f32 %v181_v12, %v113_v14 }
  0xe4   :  { %v134_v20 = vmul.f32 %v123_v15, %v123_v15  ;;  %v127_v21 = vsel %vm31_vm0, %v123_v15, 0.0 }
  0xe5   :  { %v124_v17 = vsel %vm31_vm0, %v122_v16, 0.0  ;;  %v133_v18 = vmul.f32 %v122_v16, %v122_v16 }
  0xe6   :  { %125 = vadd.xlane.f32.xlu0 %v124_v17  ;;  %v138_v22 = vsel %vm31_vm0, %v134_v20, 0.0 }
  0xe7   :  { %v135_v19 = vsel %vm31_vm0, %v133_v18, 0.0 }
  0xe8   :  { %136 = vadd.xlane.f32.xlu1 %v135_v19 }
  0xea   :  { %128 = vadd.xlane.f32.xlu0 %v127_v21 }
  0xec   :  { %139 = vadd.xlane.f32.xlu1 %v138_v22 }
 0x173   :  { %v126_v23 = vpop.xlane.xlu0 %125 }
 0x174   :  { %v131_v24 = vmul.f32 0.03125, %v126_v23 }
 0x175   :  { %v137_v25 = vpop.xlane.xlu1 %136 }
 0x176   :  { %v143_v26 = vmul.f32 %v131_v24, %v131_v24  ;;  %v141_v27 = vmul.f32 0.03125, %v137_v25  ;;  %v147_v37 = vsub.f32 %v122_v16, %v131_v24 }
 0x177   :  { %v129_v28 = vpop.xlane.xlu0 %128 }
 0x178   :  { %v145_v29 = vsub.f32 %v141_v27, %v143_v26  ;;  %v132_v30 = vmul.f32 0.03125, %v129_v28 }
 0x179   :  { %v140_v31 = vpop.xlane.xlu1 %139 }
 0x17a   :  { %v149_v32 = vadd.f32 1e-05, %v145_v29  ;;  %v144_v33 = vmul.f32 %v132_v30, %v132_v30  ;;  %v142_v34 = vmul.f32 0.03125, %v140_v31  ;;  %v148_v43 = vsub.f32 %v123_v15, %v132_v30 }
 0x17c   :  { %209 = vrsqrt.f32 %v149_v32  ;;  %v146_v35 = vsub.f32 %v142_v34, %v144_v33 }
 0x17e   :  { %v150_v36 = vadd.f32 1e-05, %v146_v35 }
 0x180   :  { %211 = vrsqrt.f32 %v150_v36 }
 0x186   :  { %v210_v38 = vpop.eup %209 }
 0x187   :  { %v153_v40 = vmul.f32 %v210_v38, %v147_v37 }
 0x189   :  { %v162_v42 = vmul.f32 %v182_v39, %v153_v40 }
 0x18a   :  { %v212_v44 = vpop.eup %211 }
 0x18b   :  { %v171_v45 = vadd.f32 %v183_v41, %v162_v42  ;;  %v154_v46 = vmul.f32 %v212_v44, %v148_v43 }
 0x18d   :  { %173 = vst.msk [vmem:[%s301_s6] sm:$0xff] %vm31_vm0, %v171_v45  ;;  %v163_v47 = vmul.f32 %v182_v39, %v154_v46 }
 0x18f   :  { %v172_v48 = vadd.f32 %v183_v41, %v163_v47 }
 0x191   :  { %174 = vst.msk [vmem:[%s301_s6 + $0x8] sm:$0xff] %vm31_vm0, %v172_v48 }

// kernel: mot_interp_forward.26
= control target key start
LH: loop header
LB: loop body
LE: loop exit
PB: predicated region body
PF: predicated region fallthrough
CT: control target
= control target key end

     0   :  { %s1166_s15 = smov 0   ;;  %s1270_s0 = inlined_call_operand.vmem [shape: f32[2,8,32], index: 0, kind: input, shape index: {}]   ;;  %s1271_s1 = inlined_call_operand.vmem [shape: f32[2,8,32], index: 1, kind: input, shape index: {}]   ;;  %s1272_s2 = inlined_call_operand.vmem [shape: f32[2,8,32], index: 2, kind: input, shape index: {}]   ;;  %s1273_s3 = inlined_call_operand.vmem [shape: f32[2,1,8], index: 3, kind: input, shape index: {}]   ;;  %s1274_s4 = inlined_call_operand.vmem [shape: f32[2,8,32], index: 4, kind: output, shape index: {}]  }
   0x1 LB: > { %s1013_s16 = sadd.s32 4294967295, %s1131_s15   ;;  %p1017_p0 = scmp.ge.s32.totalorder %s1131_s15, 1  ;;  %s1131_s15 = sphi %s1166_s15, %s14_s15  }
   0x2   : > { %p187_p1 = scmp.lt.s32.totalorder %s1131_s15, 3 }
   0x4   : > { %p188_p2 = pnand %p1017_p0, %p187_p1 }
   0x5   : > { %p222_p3 = scmp.lt.s32.totalorder (!%p188_p2), %s1013_s16, 1  ;;  %v1133_v0 = vmov (!%p188_p2), 0.0   ;;  %vm1134_vm0 = vmmov (!%p188_p2), 0   ;;  %vm251_vm1 = vcmask (!%p188_p2), 64512   ;;  %s1135_s27 = smov (!%p188_p2), 120   ;;  %vm583_vm2 = vcmask (!%p188_p2), 130112  }
   0x6   : > { %191 = sbr.rel (%p188_p2) target bundleno = 1461 (0x5b5), region = 36  ;;  %1053 = vmatprep.subr.mxu0 (!%p188_p2), %v1133_v0  ;;  %1055 = vmatprep.mubr.msk.f32.mxu0 (!%p188_p2), %vm1134_vm0, %v1133_v0  ;;  %s1136_s28 = smov (!%p188_p2), 112   ;;  %vm754_vm3 = vcmask (!%p188_p2), 195712   ;;  %vm925_vm4 = vcmask (!%p188_p2), 261312  }
   0x7   : > { %1058 = vmatprep.subr.mxu1 (!%p188_p2), %v1133_v0  ;;  %1060 = vmatprep.mubr.msk.f32.mxu1 (!%p188_p2), %vm1134_vm0, %v1133_v0  ;;  %s1137_s29 = smov (!%p188_p2), 104   ;;  %s1138_s10 = smov (!%p188_p2), 8  }
   0x8   : > { %s1139_s11 = smov (!%p188_p2), 16   ;;  %s1140_s12 = smov (!%p188_p2), 24  }
   0xd   : > { %s1276_s16 = smov (!%p222_p3, %s1013_s16), 1 }
   0xe   : > { %s1180_s17 = sshll.u32 %s1276_s16, 3  ;;  %s236_s26 = scalar_lea.vmem %s1273_s3, %s1276_s16 }
   0xf   : > { %s229_s20 = scalar_lea.vmem %s1271_s1, %s1180_s17  ;;  %s225_s23 = scalar_lea.vmem %s1270_s0, %s1180_s17  ;;  %v1198_v3 = vld [vmem:[%s236_s26] ss:$0 sm:$0xff] }
  0x10   : > { %v242_v1 = vld [vmem:[%s229_s20] sm:$0xff]  ;;  %s233_s6 = scalar_lea.vmem %s1272_s2, %s1180_s17  ;;  %s1236_s9 = scalar_lea.vmem %s1274_s4, %s1180_s17 }
  0x11   : > { %1054 = vmatpush3.xpose.msk.msra.mxu0 %vm251_vm1, %v242_v1  ;;  %v241_v2 = vld [vmem:[%s225_s23] sm:$0xff]  ;;  %415 = vrot.lane.b32.xlu1 %v242_v1, %s1135_s27 }
  0x12   : > { %1068 = vmatprep.subr.mxu0 %v1133_v0  ;;  %v1212_v13 = vld [vmem:[%s233_s6] sm:$0xff] }
  0x13   : > { %1059 = vmatpush3.msra.mxu1 %v1212_v13 }
  0x14   : > { %1056 = vmatmul.mubr.msk.f32.vlgmr.msra.gmra.mrb[0].mxu0 %vm251_vm1, %v241_v2  ;;  %1063 = vmatprep.subr.mxu1 %v1133_v0 }
  0x15   : > { %1070 = vmatprep.mubr.msk.f32.mxu0 %vm1134_vm0, %v1133_v0  ;;  %413 = vrot.lane.b32.xlu1 %v241_v2, %s1135_s27 }
  0x19   : > { %585 = vrot.lane.b32.xlu1 %v241_v2, %s1136_s28 }
  0x1d   : > { %758 = vrot.lane.b32.xlu1 %v242_v1, %s1137_s29 }
  0x21   : > { %756 = vrot.lane.b32.xlu1 %v241_v2, %s1137_s29 }
  0x83   : > { %v416_v14 = vpop.permute.xlu1 %415 }
  0x87   : > { %v414_v16 = vpop.permute.xlu1 %413 }
  0x8b   : > { %v586_v18 = vpop.permute.xlu1 %585 }
  0x8f   : > { %v759_v21 = vpop.permute.xlu1 %758 }
  0x93   : > { %v757_v22 = vpop.permute.xlu1 %756 }
  0xe7   : > { %v324_v4 = vpop.f32.mrb[0].mxu0 }
  0xe8   : > { %v325_v5 = vadd.f32 %v1198_v3, %v324_v4  ;;  %v1057_v6 = vpop.f32.mrb[1].mxu0 }
  0xea   : > { %v328_v7 = vsel %vm251_vm1, %v325_v5, -inf }
  0xeb   : > { %329 = vmax.xlane.f32.xlu0 %v328_v7 }
 0x178   : > { %v330_v8 = vpop.xlane.xlu0 %329 }
 0x179   : > { %v331_v9 = vsub.f32 %v325_v5, %v330_v8 }
 0x17b   : > { %v332_v10 = vmul.f32 1.442695, %v331_v9 }
 0x17d   : > { %1109 = vpow2.f32 %v332_v10 }
 0x187   : > { %v1110_v11 = vpop.eup %1109 }
 0x188   : > { %v334_v12 = vsel %vm251_vm1, %v1110_v11, 0.0 }
 0x189   : > { %335 = vadd.xlane.f32.xlu0 %v334_v12 }
 0x19f   : > { %587 = vrot.lane.b32.xlu0 %v242_v1, %s1136_s28 }
 0x216   : > { %v336_v15 = vpop.xlane.xlu0 %335 }
 0x217   : > { %1111 = vrcp.f32 %v336_v15 }
 0x21a   : > { %v588_v20 = vpop.permute.xlu0 %587 }
 0x221   : > { %v1112_v17 = vpop.eup %1111 }
 0x222   : > { %v338_v19 = vmul.f32 %v1112_v17, %v1110_v11 }
 0x224   : > { %1061 = vmatmul.mubr.msk.f32.vlgmr.msra.gmra.mrb[0].mxu1 %vm251_vm1, %v338_v19 }
 0x225   : > { %1064 = vmatpush3.xpose.msk.msra.mxu1 %vm251_vm1, %v416_v14  ;;  %1065 = vmatprep.mubr.msk.f32.mxu1 %vm1134_vm0, %v1133_v0 }
 0x226   : > { %1073 = vmatprep.subr.mxu1 %v1133_v0 }
 0x228   : > { %1066 = vmatmul.mubr.msk.f32.vlgmr.msra.gmra.mrb[2].mxu1 %vm251_vm1, %v414_v16 }
 0x229   : > { %1074 = vmatpush3.xpose.msk.msra.mxu1 %vm251_vm1, %v588_v20  ;;  %1075 = vmatprep.mubr.msk.f32.mxu1 %vm1134_vm0, %v1133_v0 }
 0x22a   : > { %1083 = vmatprep.subr.mxu1 %v1133_v0 }
 0x22c   : > { %1076 = vmatmul.mubr.msk.f32.vlgmr.msra.gmra.mrb[4].mxu1 %vm251_vm1, %v586_v18 }
 0x22d   : > { %1084 = vmatpush3.xpose.msk.msra.mxu1 %vm251_vm1, %v759_v21  ;;  %1085 = vmatprep.mubr.msk.f32.mxu1 %vm1134_vm0, %v1133_v0 }
 0x230   : > { %1086 = vmatmul.mubr.msk.f32.vlgmr.msra.gmra.mrb[6].mxu1 %vm251_vm1, %v757_v22 }
 0x2f7   : > { %v408_v23 = vpop.f32.mrb[0].mxu1 }
 0x2f8   : > { %412 = vst.msk [vmem:[%s1236_s9] sm:$0xff] %vm251_vm1, %v408_v23  ;;  %v1062_v24 = vpop.f32.mrb[1].mxu1 }
 0x2fb   : > { %v487_v25 = vpop.f32.mrb[2].mxu1 }
 0x2fc   : > { %v488_v26 = vadd.f32 %v1198_v3, %v487_v25  ;;  %v1067_v27 = vpop.f32.mrb[3].mxu1 }
 0x2fe   : > { %v491_v28 = vsel %vm251_vm1, %v488_v26, -inf }
 0x2ff   : > { %492 = vmax.xlane.f32.xlu1 %v491_v28  ;;  %v659_v29 = vpop.f32.mrb[4].mxu1 }
 0x300   : > { %v660_v30 = vadd.f32 %v1198_v3, %v659_v29  ;;  %v1077_v31 = vpop.f32.mrb[5].mxu1 }
 0x302   : > { %v663_v32 = vsel %vm251_vm1, %v660_v30, -inf }
 0x303   : > { %664 = vmax.xlane.f32.xlu0 %v663_v32  ;;  %v830_v33 = vpop.f32.mrb[6].mxu1 }
 0x304   : > { %v831_v34 = vadd.f32 %v1198_v3, %v830_v33  ;;  %v1087_v35 = vpop.f32.mrb[7].mxu1 }
 0x306   : > { %v834_v36 = vsel %vm251_vm1, %v831_v34, -inf }
 0x307   : > { %835 = vmax.xlane.f32.xlu1 %v834_v36 }
 0x38c   : > { %v493_v37 = vpop.xlane.xlu1 %492 }
 0x38d   : > { %v494_v38 = vsub.f32 %v488_v26, %v493_v37 }
 0x38f   : > { %v495_v39 = vmul.f32 1.442695, %v494_v38 }
 0x390   : > { %v665_v40 = vpop.xlane.xlu0 %664 }
 0x391   : > { %1113 = vpow2.f32 %v495_v39  ;;  %v666_v41 = vsub.f32 %v660_v30, %v665_v40 }
 0x393   : > { %v667_v42 = vmul.f32 1.442695, %v666_v41 }
 0x394   : > { %v836_v47 = vpop.xlane.xlu1 %835 }
 0x395   : > { %1115 = vpow2.f32 %v667_v42  ;;  %v837_v48 = vsub.f32 %v831_v34, %v836_v47 }
 0x397   : > { %v838_v49 = vmul.f32 1.442695, %v837_v48 }
 0x399   : > { %1117 = vpow2.f32 %v838_v49 }
 0x39b   : > { %v1114_v43 = vpop.eup %1113 }
 0x39c   : > { %v497_v44 = vsel %vm251_vm1, %v1114_v43, 0.0 }
 0x39d   : > { %498 = vadd.xlane.f32.xlu1 %v497_v44 }
 0x39f   : > { %v1116_v45 = vpop.eup %1115 }
 0x3a0   : > { %v669_v46 = vsel %vm251_vm1, %v1116_v45, 0.0 }
 0x3a1   : > { %670 = vadd.xlane.f32.xlu0 %v669_v46 }
 0x3a3   : > { %v1118_v50 = vpop.eup %1117 }
 0x3a4   : > { %v840_v51 = vsel %vm251_vm1, %v1118_v50, 0.0 }
 0x3ae   : > { %674 = vrot.lane.b32.xlu1 %v1212_v13, %s1136_s28 }
 0x3b7   : > { %503 = vrot.lane.b32.xlu0 %v1212_v13, %s1135_s27 }
 0x3d2   : > { %841 = vadd.xlane.f32.xlu1 %v840_v51 }
 0x3e3   : > { %845 = vrot.lane.b32.xlu1 %v1212_v13, %s1137_s29 }
 0x42a   : > { %v499_v52 = vpop.xlane.xlu1 %498 }
 0x42b   : > { %1119 = vrcp.f32 %v499_v52 }
 0x42e   : > { %v671_v53 = vpop.xlane.xlu0 %670  ;;  %v675_v57 = vpop.permute.xlu1 %674 }
 0x42f   : > { %1121 = vrcp.f32 %v671_v53 }
 0x432   : > { %v504_v54 = vpop.permute.xlu0 %503 }
 0x433   : > { %1069 = vmatpush3.msra.mxu0 %v504_v54 }
 0x434   : > { %1078 = vmatprep.subr.mxu0 %v1133_v0 }
 0x435   : > { %v1120_v55 = vpop.eup %1119 }
 0x436   : > { %v501_v56 = vmul.f32 %v1120_v55, %v1114_v43 }
 0x438   : > { %1071 = vmatmul.mubr.msk.f32.vlgmr.msra.gmra.mrb[2].mxu0 %vm251_vm1, %v501_v56 }
 0x439   : > { %v1122_v58 = vpop.eup %1121  ;;  %1079 = vmatpush3.msra.mxu0 %v675_v57  ;;  %1080 = vmatprep.mubr.msk.f32.mxu0 %vm1134_vm0, %v1133_v0 }
 0x43a   : > { %v673_v59 = vmul.f32 %v1122_v58, %v1116_v45  ;;  %1088 = vmatprep.subr.mxu0 %v1133_v0 }
 0x43c   : > { %1081 = vmatmul.mubr.msk.f32.vlgmr.msra.gmra.mrb[4].mxu0 %vm251_vm1, %v673_v59 }
 0x43d   : > { %1090 = vmatprep.mubr.msk.f32.mxu0 %vm1134_vm0, %v1133_v0 }
 0x45f   : > { %v842_v60 = vpop.xlane.xlu1 %841 }
 0x460   : > { %1123 = vrcp.f32 %v842_v60 }
 0x463   : > { %v846_v61 = vpop.permute.xlu1 %845 }
 0x464   : > { %1089 = vmatpush3.msra.mxu0 %v846_v61 }
 0x46a   : > { %v1124_v62 = vpop.eup %1123 }
 0x46b   : > { %v844_v63 = vmul.f32 %v1124_v62, %v1118_v50 }
 0x46d   : > { %1091 = vmatmul.mubr.msk.f32.vlgmr.msra.gmra.mrb[6].mxu0 %vm251_vm1, %v844_v63 }
 0x50b   : > { %v575_v1 = vpop.f32.mrb[2].mxu0 }
 0x50c   : > { %580 = vrot.lane.b32.xlu0 %v575_v1, %s1138_s10  ;;  %v1072_v2 = vpop.f32.mrb[3].mxu0 }
 0x50f   : > { %v746_v3 = vpop.f32.mrb[4].mxu0 }
 0x510   : > { %751 = vrot.lane.b32.xlu1 %v746_v3, %s1139_s11  ;;  %v1082_v4 = vpop.f32.mrb[5].mxu0 }
 0x540   : > { %v917_v0 = vpop.f32.mrb[6].mxu0 }
 0x541   : > { %922 = vrot.lane.b32.xlu0 %v917_v0, %s1140_s12  ;;  %v1092_v5 = vpop.f32.mrb[7].mxu0 }
 0x57e   : > { %v581_v6 = vpop.permute.xlu0 %580 }
 0x57f   : > { %584 = vst.msk [vmem:[%s1236_s9] sm:$0xff] %vm583_vm2, %v581_v6 }
 0x582   : > { %v752_v7 = vpop.permute.xlu1 %751 }
 0x583   : > { %755 = vst.msk [vmem:[%s1236_s9] sm:$0xff] %vm754_vm3, %v752_v7 }
 0x5b3   : > { %v923_v8 = vpop.permute.xlu0 %922 }
 0x5b4   : > { %926 = vst.msk [vmem:[%s1236_s9] sm:$0xff] %vm925_vm4, %v923_v8 }
 0x5b5 PF: > { %s14_s15 = sadd.s32 1, %s1131_s15  }
 0x5b6   : > { %p11_p4 = scmp.ge.s32.totalorder %s14_s15, 4  }
 0x5b8   :  { %13 = sbr.rel (!%p11_p4) target bundleno = 1 (0x1), region = 75 }

// kernel: mot_interp_forward.47
= control target key start
LH: loop header
LB: loop body
LE: loop exit
PB: predicated region body
PF: predicated region fallthrough
CT: control target
= control target key end

     0   :  { %vm29_vm0 = vcmask 261120   ;;  %vm127_vm1 = vcmask 31744   ;;  %s238_s1 = inlined_call_operand.vmem [shape: f32[32,4], index: 1, kind: input, shape index: {}]   ;;  %s239_s0 = inlined_call_operand.vmem [shape: f32[32,32], index: 0, kind: input, shape index: {}]   ;;  %s240_s2 = inlined_call_operand.vmem [shape: f32[1,4], index: 2, kind: input, shape index: {}]   ;;  %s241_s3 = inlined_call_operand.vmem [shape: f32[32,4], index: 3, kind: output, shape index: {}]  }
   0x1   :  { %v18_v0 = vld [vmem:[%s238_s1] sm:$0xff]  ;;  %v19_v1 = vld [vmem:[%s238_s1 + $0x8] sm:$0xff]  ;;  %v20_v2 = vld [vmem:[%s238_s1 + $0x10] sm:$0xff] }
   0x2   :  { %v163_v3 = vpack.c.bf16 %v19_v1, %v18_v0  ;;  %v21_v4 = vld [vmem:[%s238_s1 + $0x18] sm:$0xff]  ;;  %v14_v5 = vld [vmem:[%s239_s0] sm:$0xff]  ;;  %v16_v6 = vld [vmem:[%s239_s0 + $0x10] sm:$0xff] }
   0x3   :  { %v167_v7 = vpack.c.bf16 %v21_v4, %v20_v2  ;;  %157 = vmatprep.mubr.msk.f32.mxu0 %vm29_vm0, %v14_v5  ;;  %160 = vmatprep.mubr.msk.f32.mxu1 %vm29_vm0, %v16_v6  ;;  %v15_v8 = vld [vmem:[%s239_s0 + $0x8] sm:$0xff]  ;;  %v17_v9 = vld [vmem:[%s239_s0 + $0x18] sm:$0xff]  ;;  %v136_v10 = vld [vmem:[%s240_s2] ss:$0 sm:$0xff] }
   0x4   :  { %164 = vmatprep.subr.bf16.mxu0 %v163_v3  ;;  %171 = vmatprep.subr.bf16.mxu1 %v163_v3 }
   0x5   :  { %166 = vmatpush3.bf16.msra.mxu0 %v163_v3  ;;  %173 = vmatpush3.bf16.msra.mxu1 %v163_v3 }
   0x6   :  { %168 = vmatprep.subr.bf16.mxu0 %v167_v7  ;;  %172 = vmatprep.subr.bf16.mxu1 %v167_v7 }
   0x9   :  { %170 = vmatpush3.bf16.msra.mxu0 %v167_v7  ;;  %174 = vmatpush3.bf16.msra.mxu1 %v167_v7 }
   0xc   :  { %158 = vmatmul.mubr.msk.f32.vlgmr.msra.gmra.mrb[0].mxu0 %vm29_vm0, %v15_v8  ;;  %161 = vmatmul.mubr.msk.f32.vlgmr.msra.gmra.mrb[0].mxu1 %vm29_vm0, %v17_v9 }
  0xdf   :  { %v159_v11 = vpop.f32.mrb[0].mxu0  ;;  %v162_v12 = vpop.f32.mrb[0].mxu1 }
  0xe0   :  { %v114_v13 = vadd.f32 %v159_v11, %v136_v10  ;;  %v124_v14 = vadd.f32 %v162_v12, %v136_v10  ;;  %v108_v15 = vpop.f32.mrb[1].mxu0  ;;  %v118_v16 = vpop.f32.mrb[1].mxu1 }
  0xe1   :  { %v109_v17 = vadd.f32 %v136_v10, %v108_v15  ;;  %v119_v18 = vadd.f32 %v136_v10, %v118_v16 }
  0xe2   :  { %129 = vst.msk [vmem:[%s241_s3 + $0x8] sm:$0xff] %vm127_vm1, %v114_v13  ;;  %131 = vst.msk [vmem:[%s241_s3 + $0x18] sm:$0xff] %vm127_vm1, %v124_v14 }
  0xe3   :  { %128 = vst.msk [vmem:[%s241_s3] sm:$0xff] %vm127_vm1, %v109_v17  ;;  %130 = vst.msk [vmem:[%s241_s3 + $0x10] sm:$0xff] %vm127_vm1, %v119_v18 }

// kernel: mot_interp_forward.28
= control target key start
LH: loop header
LB: loop body
LE: loop exit
PB: predicated region body
PF: predicated region fallthrough
CT: control target
= control target key end

     0   :  { %vm39_vm0 = vcmask 261120   ;;  %vm131_vm1 = vcmask 523264   ;;  %s469_s1 = inlined_call_operand.vmem [shape: f32[32,64], index: 1, kind: input, shape index: {}]   ;;  %s470_s0 = inlined_call_operand.vmem [shape: f32[16,32], index: 0, kind: input, shape index: {}]   ;;  %s471_s3 = inlined_call_operand.vmem [shape: f32[64,32], index: 3, kind: input, shape index: {}]   ;;  %s472_s2 = inlined_call_operand.vmem [shape: f32[1,64], index: 2, kind: input, shape index: {}]   ;;  %s473_s4 = inlined_call_operand.vmem [shape: f32[1,32], index: 4, kind: input, shape index: {}]   ;;  %s474_s5 = inlined_call_operand.vmem [shape: f32[1,32], index: 5, kind: input, shape index: {}]   ;;  %s475_s6 = inlined_call_operand.vmem [shape: f32[1,32], index: 6, kind: input, shape index: {}]   ;;  %s476_s7 = inlined_call_operand.vmem [shape: f32[16,32], index: 7, kind: output, shape index: {}]  }
   0x1   :  { %v28_v0 = vld [vmem:[%s469_s1] sm:$0xff]  ;;  %v29_v1 = vld [vmem:[%s469_s1 + $0x8] sm:$0xff]  ;;  %v30_v2 = vld [vmem:[%s469_s1 + $0x10] sm:$0xff] }
   0x2   :  { %v333_v3 = vpack.c.bf16 %v29_v1, %v28_v0  ;;  %v31_v4 = vld [vmem:[%s469_s1 + $0x18] sm:$0xff]  ;;  %v26_v5 = vld [vmem:[%s470_s0] sm:$0xff]  ;;  %v124_v8 = vld [vmem:[%s471_s3 + $0x8] sm:$0xff] }
   0x3   :  { %v337_v6 = vpack.c.bf16 %v31_v4, %v30_v2  ;;  %311 = vmatprep.mubr.msk.f32.mxu0 %vm39_vm0, %v26_v5  ;;  %v123_v7 = vld [vmem:[%s471_s3] sm:$0xff]  ;;  %v125_v9 = vld [vmem:[%s471_s3 + $0x10] sm:$0xff]  ;;  %v126_v11 = vld [vmem:[%s471_s3 + $0x18] sm:$0xff] }
   0x4   :  { %334 = vmatprep.subr.bf16.mxu0 %v333_v3  ;;  %v341_v10 = vpack.c.bf16 %v124_v8, %v123_v7  ;;  %v345_v12 = vpack.c.bf16 %v126_v11, %v125_v9  ;;  %v127_v13 = vld [vmem:[%s471_s3 + $0x20] sm:$0xff]  ;;  %v128_v14 = vld [vmem:[%s471_s3 + $0x28] sm:$0xff]  ;;  %v129_v17 = vld [vmem:[%s471_s3 + $0x30] sm:$0xff] }
   0x5   :  { %336 = vmatpush3.bf16.msra.mxu0 %v333_v3  ;;  %v349_v15 = vpack.c.bf16 %v128_v14, %v127_v13  ;;  %v27_v16 = vld [vmem:[%s470_s0 + $0x8] sm:$0xff]  ;;  %v130_v18 = vld [vmem:[%s471_s3 + $0x38] sm:$0xff]  ;;  %v279_v20 = vld [vmem:[%s472_s2] ss:$0 sm:$0xff] }
   0x6   :  { %338 = vmatprep.subr.bf16.mxu0 %v337_v6  ;;  %342 = vmatprep.subr.bf16.mxu1 %v341_v10  ;;  %v353_v19 = vpack.c.bf16 %v130_v18, %v129_v17  ;;  %v284_v29 = vld [vmem:[%s473_s4] ss:$0 sm:$0xff] }
   0x7   :  { %344 = vmatpush3.bf16.msra.mxu1 %v341_v10  ;;  %v285_v56 = vld [vmem:[%s474_s5] ss:$0 sm:$0xff] }
   0x8   :  { %346 = vmatprep.subr.bf16.mxu1 %v345_v12  ;;  %v286_v58 = vld [vmem:[%s475_s6] ss:$0 sm:$0xff] }
   0x9   :  { %340 = vmatpush3.bf16.msra.mxu0 %v337_v6 }
   0xb   :  { %348 = vmatpush3.bf16.msra.mxu1 %v345_v12 }
   0xc   :  { %312 = vmatmul.mubr.msk.f32.vlgmr.msra.gmra.mrb[0].mxu0 %vm39_vm0, %v27_v16  ;;  %350 = vmatprep.subr.bf16.mxu1 %v349_v15 }
   0xf   :  { %352 = vmatpush3.bf16.msra.mxu1 %v349_v15 }
  0x10   :  { %354 = vmatprep.subr.bf16.mxu1 %v353_v19 }
  0x13   :  { %356 = vmatpush3.bf16.msra.mxu1 %v353_v19 }
  0xdf   :  { %v313_v21 = vpop.f32.mrb[0].mxu0 }
  0xe0   :  { %v118_v22 = vadd.f32 %v313_v21, %v279_v20  ;;  %v112_v23 = vpop.f32.mrb[1].mxu0 }
  0xe1   :  { %v113_v24 = vadd.f32 %v279_v20, %v112_v23 }
  0xe2   :  { %v122_v26 = vmax.f32 %v118_v22, 0.0 }
  0xe3   :  { %v121_v25 = vmax.f32 %v113_v24, 0.0 }
  0xe5   :  { %330 = vmatprep.mubr.msk.f32.mxu1 %vm131_vm1, %v121_v25 }
  0xe6   :  { %331 = vmatmul.mubr.msk.f32.vlgmr.msra.gmra.mrb[0].mxu1 %vm131_vm1, %v122_v26 }
 0x1b9   :  { %v332_v27 = vpop.f32.mrb[0].mxu1 }
 0x1ba   :  { %v214_v28 = vadd.f32 %v332_v27, %v27_v16  ;;  %v204_v30 = vpop.f32.mrb[1].mxu1 }
 0x1bb   :  { %v213_v31 = vadd.f32 %v204_v30, %v26_v5 }
 0x1bc   :  { %v223_v32 = vadd.f32 %v284_v29, %v214_v28 }
 0x1bd   :  { %v222_v33 = vadd.f32 %v284_v29, %v213_v31 }
 0x1be   :  { %v234_v37 = vmul.f32 %v223_v32, %v223_v32  ;;  %v227_v38 = vsel %vm39_vm0, %v223_v32, 0.0 }
 0x1bf   :  { %v224_v34 = vsel %vm39_vm0, %v222_v33, 0.0  ;;  %v233_v35 = vmul.f32 %v222_v33, %v222_v33 }
 0x1c0   :  { %225 = vadd.xlane.f32.xlu0 %v224_v34  ;;  %v238_v39 = vsel %vm39_vm0, %v234_v37, 0.0 }
 0x1c1   :  { %v235_v36 = vsel %vm39_vm0, %v233_v35, 0.0 }
 0x1c2   :  { %236 = vadd.xlane.f32.xlu1 %v235_v36 }
 0x1c4   :  { %228 = vadd.xlane.f32.xlu0 %v227_v38 }
 0x1c6   :  { %239 = vadd.xlane.f32.xlu1 %v238_v39 }
 0x24d   :  { %v226_v40 = vpop.xlane.xlu0 %225 }
 0x24e   :  { %v231_v41 = vmul.f32 0.03125, %v226_v40 }
 0x24f   :  { %v237_v42 = vpop.xlane.xlu1 %236 }
 0x250   :  { %v243_v43 = vmul.f32 %v231_v41, %v231_v41  ;;  %v241_v44 = vmul.f32 0.03125, %v237_v42  ;;  %v247_v54 = vsub.f32 %v222_v33, %v231_v41 }
 0x251   :  { %v229_v45 = vpop.xlane.xlu0 %228 }
 0x252   :  { %v245_v46 = vsub.f32 %v241_v44, %v243_v43  ;;  %v232_v47 = vmul.f32 0.03125, %v229_v45 }
 0x253   :  { %v240_v48 = vpop.xlane.xlu1 %239 }
 0x254   :  { %v249_v49 = vadd.f32 1e-05, %v245_v46  ;;  %v244_v50 = vmul.f32 %v232_v47, %v232_v47  ;;  %v242_v51 = vmul.f32 0.03125, %v240_v48  ;;  %v248_v60 = vsub.f32 %v223_v32, %v232_v47 }
 0x256   :  { %357 = vrsqrt.f32 %v249_v49  ;;  %v246_v52 = vsub.f32 %v242_v51, %v244_v50 }
 0x258   :  { %v250_v53 = vadd.f32 1e-05, %v246_v52 }
 0x25a   :  { %359 = vrsqrt.f32 %v250_v53 }
 0x260   :  { %v358_v55 = vpop.eup %357 }
 0x261   :  { %v253_v57 = vmul.f32 %v358_v55, %v247_v54 }
 0x263   :  { %v262_v59 = vmul.f32 %v285_v56, %v253_v57 }
 0x264   :  { %v360_v61 = vpop.eup %359 }
 0x265   :  { %v271_v62 = vadd.f32 %v286_v58, %v262_v59  ;;  %v254_v63 = vmul.f32 %v360_v61, %v248_v60 }
 0x267   :  { %273 = vst.msk [vmem:[%s476_s7] sm:$0xff] %vm39_vm0, %v271_v62  ;;  %v263_v0 = vmul.f32 %v285_v56, %v254_v63 }
 0x269   :  { %v272_v1 = vadd.f32 %v286_v58, %v263_v0 }
 0x26b   :  { %274 = vst.msk [vmem:[%s476_s7 + $0x8] sm:$0xff] %vm39_vm0, %v272_v1 }

</bundles_post_ra>
